<compile_context>
chip_gen: v7x
topology: tpu7x:2x2x1
jax: 0.10.0
libtpu: 0.0.40
codegen_flags: <defaults>
</compile_context>

<pallas_src>
import functools
import math

import jax
import jax.numpy as jnp
from jax.experimental import pallas as pl
from jax.experimental.pallas import tpu as pltpu


def _rup(n, m):
    return -(-n // m) * m


_BTILE_CAP = 64                       # images per grid step (upper bound)
_VMEM_BUDGET = 24 * 1024 * 1024       # stay under the 32 MiB default scoped VMEM

# Tap order (oy, ox); must match the (ky, kx, cin) row order used by _pack_conv,
# the host-built masks, and the in-kernel patches layout.
_TAPS = tuple((oy, ox) for oy in (-1, 0, 1) for ox in (-1, 0, 1))


# ------------------------------------------------------------------ kernel ---
def _lira_kernel(scalars_ref,                       # SMEM (2,): [eps, poison_flag]
                 x_ref,                             # (Cp, Mblk)  lane-dense input
                 mask_ref,                          # (9, Mblk)   border masks (0/1)
                 pool_ref,                          # (Mblk, Bt_out) mean-pool matrix
                 tw1_ref, tb1_ref, tw2_ref, tb2_ref,    # trigger net (packed 2-D)
                 cw1_ref, cb1_ref, fcwT_ref, fcbT_ref,  # classifier (packed 2-D)
                 out_ref,                           # (1, NC, Bt_out)
                 xp_ref,                            # VMEM scratch (Cp, Mblk)
                 patches_ref,                       # VMEM scratch (9*Cmax, Mblk)
                 *, W, Mblk, Cp, Htp):

    def conv3x3(act, cin, w2d_ref, b_ref):
        # 'SAME' 3x3 conv as a single im2col matmul: the 9 shifted taps are
        # built with an XLU lane rotation + precomputed border mask and written
        # straight into the patches scratch, then one (Cout,9*cin)@(9*cin,Mblk).
        for t, (oy, ox) in enumerate(_TAPS):
            s = oy * W + ox
            piece = act if s == 0 else pltpu.roll(act, (-s) % Mblk, axis=1)
            if (oy, ox) != (0, 0):
                piece = piece * mask_ref[t:t + 1, :]
            patches_ref[t * cin:(t + 1) * cin, :] = piece
        return jnp.dot(w2d_ref[...], patches_ref[:9 * cin, :],
                       preferred_element_type=jnp.float32) + b_ref[...]

    x = x_ref[...]                                   # (Cp, Mblk)

    # ---- LIRA poisoning: x' = x + trigger(x) * eps (skipped on clean path) ----
    @pl.when(scalars_ref[1] > 0.5)
    def _():
        h = jnp.maximum(conv3x3(x, Cp, tw1_ref, tb1_ref), 0.0)
        t = jnp.tanh(conv3x3(h, Htp, tw2_ref, tb2_ref))
        xp_ref[...] = x + t * scalars_ref[0]

    @pl.when(scalars_ref[1] <= 0.5)
    def _():
        xp_ref[...] = x

    # ---- classifier: conv + relu -> global average pool (MXU) -> linear ----
    f = jnp.maximum(conv3x3(xp_ref[...], Cp, cw1_ref, cb1_ref), 0.0)  # (Hcp, Mblk)
    pooled = jnp.dot(f, pool_ref[...],
                     preferred_element_type=jnp.float32)              # (Hcp, Bt_out)
    logits = jnp.dot(fcwT_ref[...], pooled,
                     preferred_element_type=jnp.float32) + fcbT_ref[...]
    out_ref[0] = logits


# ----------------------------------------------------------------- wrapper ---
@functools.lru_cache(maxsize=None)
def _build_call(nblk, Btile, Bt_out, H, W, Cp, Htp, Hcp, NC):
    Mblk = Btile * H * W
    Cmax = max(Cp, Htp)
    kernel = functools.partial(_lira_kernel, W=W, Mblk=Mblk, Cp=Cp, Htp=Htp)
    grid_spec = pltpu.PrefetchScalarGridSpec(
        num_scalar_prefetch=0,
        grid=(nblk,),
        in_specs=[
            pl.BlockSpec(memory_space=pltpu.MemorySpace.SMEM),      # [eps, poison]
            pl.BlockSpec((Cp, Mblk), lambda i: (0, i)),             # x (flat, C-major)
            pl.BlockSpec((9, Mblk), lambda i: (0, 0)),              # tap border masks
            pl.BlockSpec((Mblk, Bt_out), lambda i: (0, 0)),         # mean-pool matrix
            pl.BlockSpec((Htp, 9 * Cp), lambda i: (0, 0)),          # trig conv1 w
            pl.BlockSpec((Htp, 1), lambda i: (0, 0)),               # trig conv1 b
            pl.BlockSpec((Cp, 9 * Htp), lambda i: (0, 0)),          # trig conv2 w
            pl.BlockSpec((Cp, 1), lambda i: (0, 0)),                # trig conv2 b
            pl.BlockSpec((Hcp, 9 * Cp), lambda i: (0, 0)),          # cls conv w
            pl.BlockSpec((Hcp, 1), lambda i: (0, 0)),               # cls conv b
            pl.BlockSpec((NC, Hcp), lambda i: (0, 0)),              # fc w^T
            pl.BlockSpec((NC, 1), lambda i: (0, 0)),                # fc b^T
        ],
        out_specs=pl.BlockSpec((1, NC, Bt_out), lambda i: (i, 0, 0)),
        scratch_shapes=[pltpu.VMEM((Cp, Mblk), jnp.float32),        # poisoned image
                        pltpu.VMEM((9 * Cmax, Mblk), jnp.float32)], # im2col patches
    )
    return pl.pallas_call(
        kernel,
        out_shape=jax.ShapeDtypeStruct((nblk, NC, Bt_out), jnp.float32),
        grid_spec=grid_spec,
        compiler_params=pltpu.CompilerParams(dimension_semantics=("parallel",)),
    )


def _pack_conv(w_hwio, b, cin_p, cout_p):
    """HWIO (3,3,Cin,Cout) -> (Cout_p, 9*Cin_p) matching the im2col row order."""
    kh, kw, cin, cout = w_hwio.shape
    wp = jnp.zeros((kh, kw, cin_p, cout_p), jnp.float32)
    wp = wp.at[:, :, :cin, :cout].set(jnp.asarray(w_hwio, jnp.float32))
    w2d = jnp.transpose(wp, (3, 0, 1, 2)).reshape(cout_p, kh * kw * cin_p)
    bp = jnp.zeros((cout_p, 1), jnp.float32).at[:cout, 0].set(
        jnp.asarray(b, jnp.float32).reshape(-1))
    return w2d, bp


def _tap_masks(H, W, Btile):
    """(9, Btile*H*W) f32 0/1 mask per tap: 1 where the shifted source is in-image."""
    m = jnp.arange(Btile * H * W)
    x = m % W
    y = (m // W) % H
    rows = []
    for oy, ox in _TAPS:
        valid = ((y + oy >= 0) & (y + oy <= H - 1) &
                 (x + ox >= 0) & (x + ox <= W - 1))
        rows.append(valid)
    return jnp.stack(rows).astype(jnp.float32)


def _pool_matrix(Btile, Bt_out, HW):
    """Block-diagonal (Btile*HW, Bt_out) matrix: mean-pool each image via one matmul."""
    img = jnp.arange(Btile * HW) // HW
    col = jnp.arange(Bt_out)
    return (img[:, None] == col[None, :]).astype(jnp.float32) * (1.0 / HW)


def _vmem_estimate(Btile, HW, Cp, Htp, Hcp):
    """Rough bytes of VMEM needed per grid step (inputs double-buffered + scratch)."""
    Mblk = Btile * HW
    Bt_out = _rup(Btile, 8)
    Cmax = max(Cp, Htp)
    rows = (2 * Cp          # x input block (double-buffered)
            + 2 * 16        # tap masks (9 rows padded to 16, double-buffered)
            + Cp            # xp scratch
            + 9 * Cmax      # im2col patches scratch
            + 2 * max(Htp, Hcp))  # live activations, rough
    return 4 * (rows * Mblk + 2 * Mblk * Bt_out)


def lira_forward(x_nchw, params, eps, poison=False, update='classifier'):
    """Pallas implementation of LiraModel.forward.  Returns (B, num_classes)."""
    # TODO(synk): freeze_trigger_model (requires_grad=False) is training-only;
    # it has no forward-pass equivalent.
    if poison:
        if update == 'trigger':
            trig = params['trigger_model']
        elif update == 'classifier':
            trig = params['fixed_trigger_model']
        else:
            raise ValueError('update must be either trigger or classifier')
    else:
        trig = params['fixed_trigger_model']   # skipped at runtime via pl.when

    cls = params['classifier']
    x = jnp.asarray(x_nchw, jnp.float32)       # NCHW, like PyTorch
    B, C, H, W = x.shape
    HW = H * W
    Ht = trig['w1'].shape[3]
    Hc = cls['w1'].shape[3]
    NC = cls['fc_w'].shape[1]

    Cp, Htp, Hcp = _rup(C, 8), _rup(Ht, 8), _rup(Hc, 8)

    # Adaptive batch tile: small B -> one snug block; large B -> >= 2 grid steps
    # (v7x megacore) capped so one step fits comfortably in scoped VMEM.
    lane_mult = 128 // math.gcd(HW, 128)          # keep Mblk a multiple of 128
    Btile = min(_BTILE_CAP, -(-B // 2)) if B > 8 else B
    Btile = _rup(max(Btile, 1), lane_mult)
    while Btile > lane_mult and _vmem_estimate(Btile, HW, Cp, Htp, Hcp) > _VMEM_BUDGET:
        Btile = _rup(max(Btile // 2, lane_mult), lane_mult)
    Bpad = _rup(B, Btile)
    nblk = Bpad // Btile
    Bt_out = _rup(Btile, 8)                       # lane width of pooled/logits/output

    # NCHW -> zero-padded (Cp, Bpad*H*W): channels on sublanes, batch*spatial
    # lane-dense.  Flat index m = b*H*W + y*W + x.
    xb = jnp.zeros((Bpad, Cp, H, W), jnp.float32).at[:B, :C].set(x)
    x2d = jnp.transpose(xb, (1, 0, 2, 3)).reshape(Cp, Bpad * HW)

    tw1, tb1 = _pack_conv(trig['w1'], trig['b1'], Cp, Htp)
    tw2, tb2 = _pack_conv(trig['w2'], trig['b2'], Htp, Cp)
    cw1, cb1 = _pack_conv(cls['w1'], cls['b1'], Cp, Hcp)
    fcwT = jnp.zeros((NC, Hcp), jnp.float32).at[:, :Hc].set(
        jnp.asarray(cls['fc_w'], jnp.float32).T)
    fcbT = jnp.asarray(cls['fc_b'], jnp.float32).reshape(NC, 1)

    masks = _tap_masks(H, W, Btile)               # hoisted out of the kernel
    pool = _pool_matrix(Btile, Bt_out, HW)        # pooling as one MXU matmul

    # Runtime scalars -> no recompile per eps / poison / update.
    scalars = jnp.array([float(eps), 1.0 if poison else 0.0], jnp.float32)

    call = _build_call(nblk, Btile, Bt_out, H, W, Cp, Htp, Hcp, NC)
    out = call(scalars, x2d, masks, pool, tw1, tb1, tw2, tb2, cw1, cb1, fcwT, fcbT)
    # (nblk, NC, Bt_out) -> (nblk, Btile, NC) -> (Bpad, NC) -> (B, NC)
    out = jnp.transpose(out, (0, 2, 1))[:, :Btile, :]
    return out.reshape(Bpad, NC)[:B]


# ---------------------------------------------------------- params & reference
def init_params(key, C, Ht, Hc, NC):
    ks = jax.random.split(key, 12)
    w = lambda k, s: jax.random.normal(k, s, jnp.float32) * 0.1
    trigger = dict(w1=w(ks[0], (3, 3, C, Ht)), b1=w(ks[1], (1, Ht)),
                   w2=w(ks[2], (3, 3, Ht, C)), b2=w(ks[3], (1, C)))
    fixed = dict(w1=w(ks[4], (3, 3, C, Ht)), b1=w(ks[5], (1, Ht)),
                 w2=w(ks[6], (3, 3, Ht, C)), b2=w(ks[7], (1, C)))
    classifier = dict(w1=w(ks[8], (3, 3, C, Hc)), b1=w(ks[9], (1, Hc)),
                      fc_w=w(ks[10], (Hc, NC)), fc_b=w(ks[11], (1, NC)))
    return dict(trigger_model=trigger, fixed_trigger_model=fixed,
                classifier=classifier)


def ref_forward(x_nchw, params, eps, poison, update):
    x = jnp.transpose(x_nchw, (0, 2, 3, 1)).astype(jnp.float32)   # NCHW -> NHWC

    def conv(y, w, b):
        out = jax.lax.conv_general_dilated(
            y, w, (1, 1), 'SAME', dimension_numbers=('NHWC', 'HWIO', 'NHWC'))
        return out + b

    def trig_fn(y, p):
        h = jax.nn.relu(conv(y, p['w1'], p['b1']))
        return jnp.tanh(conv(h, p['w2'], p['b2']))

    if poison:
        p = params['trigger_model'] if update == 'trigger' else params['fixed_trigger_model']
        x = x + trig_fn(x, p) * eps
    cls = params['classifier']
    f = jax.nn.relu(conv(x, cls['w1'], cls['b1']))
    pooled = jnp.mean(f, axis=(1, 2))
    return pooled @ cls['fc_w'] + cls['fc_b']


# -------------------------------------------------------------------- main ---
if __name__ == "__main__":
    key = jax.random.PRNGKey(0)
    B, C, H, W = 2, 4, 16, 16
    Ht, Hc, NC = 8, 8, 10
    eps = 0.05

    kp, kx = jax.random.split(key)
    params = init_params(kp, C, Ht, Hc, NC)
    x = jax.random.normal(kx, (B, C, H, W), jnp.float32)   # NCHW, like PyTorch

    for poison, update in [(True, 'classifier'), (True, 'trigger'), (False, 'classifier')]:
        got = jax.block_until_ready(
            lira_forward(x, params, eps, poison=poison, update=update))
        want = ref_forward(x, params, eps, poison, update)
        assert got.shape == (B, NC), got.shape
        assert jnp.allclose(got, want, atol=1e-4, rtol=1e-4), (poison, update, got, want)

    print("KERNEL_OK")
</pallas_src>

<mosaic_0001>
module attributes {stable_mosaic.version = 11 : i64} {
  func.func @_lira_kernel(%arg0: i32, %arg1: memref<2xf32, #tpu.memory_space<smem>>, %arg2: memref<8x512xf32, #tpu.memory_space<vmem>>, %arg3: memref<9x512xf32, #tpu.memory_space<vmem>>, %arg4: memref<512x8xf32, #tpu.memory_space<vmem>>, %arg5: memref<8x72xf32, #tpu.memory_space<vmem>>, %arg6: memref<8x1xf32, #tpu.memory_space<vmem>>, %arg7: memref<8x72xf32, #tpu.memory_space<vmem>>, %arg8: memref<8x1xf32, #tpu.memory_space<vmem>>, %arg9: memref<8x72xf32, #tpu.memory_space<vmem>>, %arg10: memref<8x1xf32, #tpu.memory_space<vmem>>, %arg11: memref<10x8xf32, #tpu.memory_space<vmem>>, %arg12: memref<10x1xf32, #tpu.memory_space<vmem>>, %arg13: memref<1x10x8xf32, #tpu.memory_space<vmem>>, %arg14: memref<8x512xf32, #tpu.memory_space<vmem>>, %arg15: memref<72x512xf32, #tpu.memory_space<vmem>>) attributes {dimension_semantics = [#tpu.dimension_semantics<parallel>], iteration_bounds = array<i64: 1>, scalar_prefetch = 0 : i64, scratch_operands = 2 : i64, tpu.core_type = #tpu.core_type<tc>, window_params = [{transform_indices = @transform_0, window_bounds = array<i64: 2>}, {transform_indices = @transform_1, window_bounds = array<i64: 8, 512>}, {pipeline_mode = #tpu.pipeline_mode<synchronous>, transform_indices = @transform_2, window_bounds = array<i64: 9, 512>}, {pipeline_mode = #tpu.pipeline_mode<synchronous>, transform_indices = @transform_3, window_bounds = array<i64: 512, 8>}, {pipeline_mode = #tpu.pipeline_mode<synchronous>, transform_indices = @transform_4, window_bounds = array<i64: 8, 72>}, {pipeline_mode = #tpu.pipeline_mode<synchronous>, transform_indices = @transform_5, window_bounds = array<i64: 8, 1>}, {pipeline_mode = #tpu.pipeline_mode<synchronous>, transform_indices = @transform_6, window_bounds = array<i64: 8, 72>}, {pipeline_mode = #tpu.pipeline_mode<synchronous>, transform_indices = @transform_7, window_bounds = array<i64: 8, 1>}, {pipeline_mode = #tpu.pipeline_mode<synchronous>, transform_indices = @transform_8, window_bounds = array<i64: 8, 72>}, {pipeline_mode = #tpu.pipeline_mode<synchronous>, transform_indices = @transform_9, window_bounds = array<i64: 8, 1>}, {pipeline_mode = #tpu.pipeline_mode<synchronous>, transform_indices = @transform_10, window_bounds = array<i64: 10, 8>}, {pipeline_mode = #tpu.pipeline_mode<synchronous>, transform_indices = @transform_11, window_bounds = array<i64: 10, 1>}, {transform_indices = @transform_12, window_bounds = array<i64: 1, 10, 8>}]} {
    %c0 = arith.constant 0 : index
    %c0_0 = arith.constant 0 : index
    %0 = vector.load %arg2[%c0, %c0_0] : memref<8x512xf32, #tpu.memory_space<vmem>>, vector<8x512xf32>
    %c1 = arith.constant 1 : index
    %1 = memref.load %arg1[%c1] : memref<2xf32, #tpu.memory_space<smem>>
    %cst = arith.constant 5.000000e-01 : f32
    %2 = arith.cmpf ogt, %1, %cst : f32
    %3 = arith.extui %2 : i1 to i32
    %c0_i32 = arith.constant 0 : i32
    %4 = arith.cmpi ne, %3, %c0_i32 : i32
    scf.if %4 {
      %c17_i32_46 = arith.constant 17 : i32
      %69 = tpu.dynamic_rotate %0 by %c17_i32_46 dim 1 : vector<8x512xf32>, i32 -> vector<8x512xf32>
      %c0_47 = arith.constant 0 : index
      %c0_48 = arith.constant 0 : index
      %70 = vector.load %arg3[%c0_47, %c0_48] : memref<9x512xf32, #tpu.memory_space<vmem>>, vector<1x512xf32>
      %71 = vector.broadcast %70 : vector<1x512xf32> to vector<8x512xf32>
      %72 = arith.mulf %69, %71 : vector<8x512xf32>
      %c0_49 = arith.constant 0 : index
      %c0_50 = arith.constant 0 : index
      %73 = vector.load %arg15[%c0_49, %c0_50] : memref<72x512xf32, #tpu.memory_space<vmem>>, vector<8x512xf32>
      tpu.vector_store %arg15[%c0_49, %c0_50], %72 {strides = array<i32>} : memref<72x512xf32, #tpu.memory_space<vmem>>, vector<8x512xf32>,
      %c16_i32_51 = arith.constant 16 : i32
      %74 = tpu.dynamic_rotate %0 by %c16_i32_51 dim 1 : vector<8x512xf32>, i32 -> vector<8x512xf32>
      %c1_52 = arith.constant 1 : index
      %c0_53 = arith.constant 0 : index
      %75 = vector.load %arg3[%c1_52, %c0_53] : memref<9x512xf32, #tpu.memory_space<vmem>>, vector<1x512xf32>
      %76 = vector.broadcast %75 : vector<1x512xf32> to vector<8x512xf32>
      %77 = arith.mulf %74, %76 : vector<8x512xf32>
      %c8_54 = arith.constant 8 : index
      %c0_55 = arith.constant 0 : index
      %78 = vector.load %arg15[%c8_54, %c0_55] : memref<72x512xf32, #tpu.memory_space<vmem>>, vector<8x512xf32>
      tpu.vector_store %arg15[%c8_54, %c0_55], %77 {strides = array<i32>} : memref<72x512xf32, #tpu.memory_space<vmem>>, vector<8x512xf32>,
      %c15_i32_56 = arith.constant 15 : i32
      %79 = tpu.dynamic_rotate %0 by %c15_i32_56 dim 1 : vector<8x512xf32>, i32 -> vector<8x512xf32>
      %c2_57 = arith.constant 2 : index
      %c0_58 = arith.constant 0 : index
      %80 = vector.load %arg3[%c2_57, %c0_58] : memref<9x512xf32, #tpu.memory_space<vmem>>, vector<1x512xf32>
      %81 = vector.broadcast %80 : vector<1x512xf32> to vector<8x512xf32>
      %82 = arith.mulf %79, %81 : vector<8x512xf32>
      %c16_59 = arith.constant 16 : index
      %c0_60 = arith.constant 0 : index
      %83 = vector.load %arg15[%c16_59, %c0_60] : memref<72x512xf32, #tpu.memory_space<vmem>>, vector<8x512xf32>
      tpu.vector_store %arg15[%c16_59, %c0_60], %82 {strides = array<i32>} : memref<72x512xf32, #tpu.memory_space<vmem>>, vector<8x512xf32>,
      %c1_i32_61 = arith.constant 1 : i32
      %84 = tpu.dynamic_rotate %0 by %c1_i32_61 dim 1 : vector<8x512xf32>, i32 -> vector<8x512xf32>
      %c3_62 = arith.constant 3 : index
      %c0_63 = arith.constant 0 : index
      %85 = vector.load %arg3[%c3_62, %c0_63] : memref<9x512xf32, #tpu.memory_space<vmem>>, vector<1x512xf32>
      %86 = vector.broadcast %85 : vector<1x512xf32> to vector<8x512xf32>
      %87 = arith.mulf %84, %86 : vector<8x512xf32>
      %c24_64 = arith.constant 24 : index
      %c0_65 = arith.constant 0 : index
      %88 = vector.load %arg15[%c24_64, %c0_65] : memref<72x512xf32, #tpu.memory_space<vmem>>, vector<8x512xf32>
      tpu.vector_store %arg15[%c24_64, %c0_65], %87 {strides = array<i32>} : memref<72x512xf32, #tpu.memory_space<vmem>>, vector<8x512xf32>,
      %c32_66 = arith.constant 32 : index
      %c0_67 = arith.constant 0 : index
      %89 = vector.load %arg15[%c32_66, %c0_67] : memref<72x512xf32, #tpu.memory_space<vmem>>, vector<8x512xf32>
      tpu.vector_store %arg15[%c32_66, %c0_67], %0 {strides = array<i32>} : memref<72x512xf32, #tpu.memory_space<vmem>>, vector<8x512xf32>,
      %c511_i32_68 = arith.constant 511 : i32
      %90 = tpu.dynamic_rotate %0 by %c511_i32_68 dim 1 : vector<8x512xf32>, i32 -> vector<8x512xf32>
      %c5_69 = arith.constant 5 : index
      %c0_70 = arith.constant 0 : index
      %91 = vector.load %arg3[%c5_69, %c0_70] : memref<9x512xf32, #tpu.memory_space<vmem>>, vector<1x512xf32>
      %92 = vector.broadcast %91 : vector<1x512xf32> to vector<8x512xf32>
      %93 = arith.mulf %90, %92 : vector<8x512xf32>
      %c40_71 = arith.constant 40 : index
      %c0_72 = arith.constant 0 : index
      %94 = vector.load %arg15[%c40_71, %c0_72] : memref<72x512xf32, #tpu.memory_space<vmem>>, vector<8x512xf32>
      tpu.vector_store %arg15[%c40_71, %c0_72], %93 {strides = array<i32>} : memref<72x512xf32, #tpu.memory_space<vmem>>, vector<8x512xf32>,
      %c497_i32_73 = arith.constant 497 : i32
      %95 = tpu.dynamic_rotate %0 by %c497_i32_73 dim 1 : vector<8x512xf32>, i32 -> vector<8x512xf32>
      %c6_74 = arith.constant 6 : index
      %c0_75 = arith.constant 0 : index
      %96 = vector.load %arg3[%c6_74, %c0_75] : memref<9x512xf32, #tpu.memory_space<vmem>>, vector<1x512xf32>
      %97 = vector.broadcast %96 : vector<1x512xf32> to vector<8x512xf32>
      %98 = arith.mulf %95, %97 : vector<8x512xf32>
      %c48_76 = arith.constant 48 : index
      %c0_77 = arith.constant 0 : index
      %99 = vector.load %arg15[%c48_76, %c0_77] : memref<72x512xf32, #tpu.memory_space<vmem>>, vector<8x512xf32>
      tpu.vector_store %arg15[%c48_76, %c0_77], %98 {strides = array<i32>} : memref<72x512xf32, #tpu.memory_space<vmem>>, vector<8x512xf32>,
      %c496_i32_78 = arith.constant 496 : i32
      %100 = tpu.dynamic_rotate %0 by %c496_i32_78 dim 1 : vector<8x512xf32>, i32 -> vector<8x512xf32>
      %c7_79 = arith.constant 7 : index
      %c0_80 = arith.constant 0 : index
      %101 = vector.load %arg3[%c7_79, %c0_80] : memref<9x512xf32, #tpu.memory_space<vmem>>, vector<1x512xf32>
      %102 = vector.broadcast %101 : vector<1x512xf32> to vector<8x512xf32>
      %103 = arith.mulf %100, %102 : vector<8x512xf32>
      %c56_81 = arith.constant 56 : index
      %c0_82 = arith.constant 0 : index
      %104 = vector.load %arg15[%c56_81, %c0_82] : memref<72x512xf32, #tpu.memory_space<vmem>>, vector<8x512xf32>
      tpu.vector_store %arg15[%c56_81, %c0_82], %103 {strides = array<i32>} : memref<72x512xf32, #tpu.memory_space<vmem>>, vector<8x512xf32>,
      %c495_i32_83 = arith.constant 495 : i32
      %105 = tpu.dynamic_rotate %0 by %c495_i32_83 dim 1 : vector<8x512xf32>, i32 -> vector<8x512xf32>
      %c8_84 = arith.constant 8 : index
      %c0_85 = arith.constant 0 : index
      %106 = vector.load %arg3[%c8_84, %c0_85] : memref<9x512xf32, #tpu.memory_space<vmem>>, vector<1x512xf32>
      %107 = vector.broadcast %106 : vector<1x512xf32> to vector<8x512xf32>
      %108 = arith.mulf %105, %107 : vector<8x512xf32>
      %c64_86 = arith.constant 64 : index
      %c0_87 = arith.constant 0 : index
      %109 = vector.load %arg15[%c64_86, %c0_87] : memref<72x512xf32, #tpu.memory_space<vmem>>, vector<8x512xf32>
      tpu.vector_store %arg15[%c64_86, %c0_87], %108 {strides = array<i32>} : memref<72x512xf32, #tpu.memory_space<vmem>>, vector<8x512xf32>,
      %c0_88 = arith.constant 0 : index
      %c0_89 = arith.constant 0 : index
      %110 = vector.load %arg5[%c0_88, %c0_89] : memref<8x72xf32, #tpu.memory_space<vmem>>, vector<8x72xf32>
      %c0_90 = arith.constant 0 : index
      %c0_91 = arith.constant 0 : index
      %111 = vector.load %arg15[%c0_90, %c0_91] : memref<72x512xf32, #tpu.memory_space<vmem>>, vector<72x512xf32>
      %cst_92 = arith.constant dense<0.000000e+00> : vector<8x512xf32>
      %112 = tpu.matmul %110, %111, %cst_92 {dimension_numbers = #tpu.dot_dimension_numbers<[1], [0], [0], [1], [0, 0, 1, 1], [], []>} : vector<8x72xf32>, vector<72x512xf32>, vector<8x512xf32> -> vector<8x512xf32>
      %c0_93 = arith.constant 0 : index
      %c0_94 = arith.constant 0 : index
      %113 = vector.load %arg6[%c0_93, %c0_94] : memref<8x1xf32, #tpu.memory_space<vmem>>, vector<8x1xf32>
      %114 = vector.broadcast %113 : vector<8x1xf32> to vector<8x512xf32>
      %115 = arith.addf %112, %114 : vector<8x512xf32>
      %cst_95 = arith.constant 0.000000e+00 : f32
      %116 = vector.broadcast %cst_95 : f32 to vector<8x512xf32>
      %117 = arith.maximumf %115, %116 : vector<8x512xf32>
      %c17_i32_96 = arith.constant 17 : i32
      %118 = tpu.dynamic_rotate %117 by %c17_i32_96 dim 1 : vector<8x512xf32>, i32 -> vector<8x512xf32>
      %c0_97 = arith.constant 0 : index
      %c0_98 = arith.constant 0 : index
      %119 = vector.load %arg3[%c0_97, %c0_98] : memref<9x512xf32, #tpu.memory_space<vmem>>, vector<1x512xf32>
      %120 = vector.broadcast %119 : vector<1x512xf32> to vector<8x512xf32>
      %121 = arith.mulf %118, %120 : vector<8x512xf32>
      %c0_99 = arith.constant 0 : index
      %c0_100 = arith.constant 0 : index
      %122 = vector.load %arg15[%c0_99, %c0_100] : memref<72x512xf32, #tpu.memory_space<vmem>>, vector<8x512xf32>
      tpu.vector_store %arg15[%c0_99, %c0_100], %121 {strides = array<i32>} : memref<72x512xf32, #tpu.memory_space<vmem>>, vector<8x512xf32>,
      %c16_i32_101 = arith.constant 16 : i32
      %123 = tpu.dynamic_rotate %117 by %c16_i32_101 dim 1 : vector<8x512xf32>, i32 -> vector<8x512xf32>
      %c1_102 = arith.constant 1 : index
      %c0_103 = arith.constant 0 : index
      %124 = vector.load %arg3[%c1_102, %c0_103] : memref<9x512xf32, #tpu.memory_space<vmem>>, vector<1x512xf32>
      %125 = vector.broadcast %124 : vector<1x512xf32> to vector<8x512xf32>
      %126 = arith.mulf %123, %125 : vector<8x512xf32>
      %c8_104 = arith.constant 8 : index
      %c0_105 = arith.constant 0 : index
      %127 = vector.load %arg15[%c8_104, %c0_105] : memref<72x512xf32, #tpu.memory_space<vmem>>, vector<8x512xf32>
      tpu.vector_store %arg15[%c8_104, %c0_105], %126 {strides = array<i32>} : memref<72x512xf32, #tpu.memory_space<vmem>>, vector<8x512xf32>,
      %c15_i32_106 = arith.constant 15 : i32
      %128 = tpu.dynamic_rotate %117 by %c15_i32_106 dim 1 : vector<8x512xf32>, i32 -> vector<8x512xf32>
      %c2_107 = arith.constant 2 : index
      %c0_108 = arith.constant 0 : index
      %129 = vector.load %arg3[%c2_107, %c0_108] : memref<9x512xf32, #tpu.memory_space<vmem>>, vector<1x512xf32>
      %130 = vector.broadcast %129 : vector<1x512xf32> to vector<8x512xf32>
      %131 = arith.mulf %128, %130 : vector<8x512xf32>
      %c16_109 = arith.constant 16 : index
      %c0_110 = arith.constant 0 : index
      %132 = vector.load %arg15[%c16_109, %c0_110] : memref<72x512xf32, #tpu.memory_space<vmem>>, vector<8x512xf32>
      tpu.vector_store %arg15[%c16_109, %c0_110], %131 {strides = array<i32>} : memref<72x512xf32, #tpu.memory_space<vmem>>, vector<8x512xf32>,
      %c1_i32_111 = arith.constant 1 : i32
      %133 = tpu.dynamic_rotate %117 by %c1_i32_111 dim 1 : vector<8x512xf32>, i32 -> vector<8x512xf32>
      %c3_112 = arith.constant 3 : index
      %c0_113 = arith.constant 0 : index
      %134 = vector.load %arg3[%c3_112, %c0_113] : memref<9x512xf32, #tpu.memory_space<vmem>>, vector<1x512xf32>
      %135 = vector.broadcast %134 : vector<1x512xf32> to vector<8x512xf32>
      %136 = arith.mulf %133, %135 : vector<8x512xf32>
      %c24_114 = arith.constant 24 : index
      %c0_115 = arith.constant 0 : index
      %137 = vector.load %arg15[%c24_114, %c0_115] : memref<72x512xf32, #tpu.memory_space<vmem>>, vector<8x512xf32>
      tpu.vector_store %arg15[%c24_114, %c0_115], %136 {strides = array<i32>} : memref<72x512xf32, #tpu.memory_space<vmem>>, vector<8x512xf32>,
      %c32_116 = arith.constant 32 : index
      %c0_117 = arith.constant 0 : index
      %138 = vector.load %arg15[%c32_116, %c0_117] : memref<72x512xf32, #tpu.memory_space<vmem>>, vector<8x512xf32>
      tpu.vector_store %arg15[%c32_116, %c0_117], %117 {strides = array<i32>} : memref<72x512xf32, #tpu.memory_space<vmem>>, vector<8x512xf32>,
      %c511_i32_118 = arith.constant 511 : i32
      %139 = tpu.dynamic_rotate %117 by %c511_i32_118 dim 1 : vector<8x512xf32>, i32 -> vector<8x512xf32>
      %c5_119 = arith.constant 5 : index
      %c0_120 = arith.constant 0 : index
      %140 = vector.load %arg3[%c5_119, %c0_120] : memref<9x512xf32, #tpu.memory_space<vmem>>, vector<1x512xf32>
      %141 = vector.broadcast %140 : vector<1x512xf32> to vector<8x512xf32>
      %142 = arith.mulf %139, %141 : vector<8x512xf32>
      %c40_121 = arith.constant 40 : index
      %c0_122 = arith.constant 0 : index
      %143 = vector.load %arg15[%c40_121, %c0_122] : memref<72x512xf32, #tpu.memory_space<vmem>>, vector<8x512xf32>
      tpu.vector_store %arg15[%c40_121, %c0_122], %142 {strides = array<i32>} : memref<72x512xf32, #tpu.memory_space<vmem>>, vector<8x512xf32>,
      %c497_i32_123 = arith.constant 497 : i32
      %144 = tpu.dynamic_rotate %117 by %c497_i32_123 dim 1 : vector<8x512xf32>, i32 -> vector<8x512xf32>
      %c6_124 = arith.constant 6 : index
      %c0_125 = arith.constant 0 : index
      %145 = vector.load %arg3[%c6_124, %c0_125] : memref<9x512xf32, #tpu.memory_space<vmem>>, vector<1x512xf32>
      %146 = vector.broadcast %145 : vector<1x512xf32> to vector<8x512xf32>
      %147 = arith.mulf %144, %146 : vector<8x512xf32>
      %c48_126 = arith.constant 48 : index
      %c0_127 = arith.constant 0 : index
      %148 = vector.load %arg15[%c48_126, %c0_127] : memref<72x512xf32, #tpu.memory_space<vmem>>, vector<8x512xf32>
      tpu.vector_store %arg15[%c48_126, %c0_127], %147 {strides = array<i32>} : memref<72x512xf32, #tpu.memory_space<vmem>>, vector<8x512xf32>,
      %c496_i32_128 = arith.constant 496 : i32
      %149 = tpu.dynamic_rotate %117 by %c496_i32_128 dim 1 : vector<8x512xf32>, i32 -> vector<8x512xf32>
      %c7_129 = arith.constant 7 : index
      %c0_130 = arith.constant 0 : index
      %150 = vector.load %arg3[%c7_129, %c0_130] : memref<9x512xf32, #tpu.memory_space<vmem>>, vector<1x512xf32>
      %151 = vector.broadcast %150 : vector<1x512xf32> to vector<8x512xf32>
      %152 = arith.mulf %149, %151 : vector<8x512xf32>
      %c56_131 = arith.constant 56 : index
      %c0_132 = arith.constant 0 : index
      %153 = vector.load %arg15[%c56_131, %c0_132] : memref<72x512xf32, #tpu.memory_space<vmem>>, vector<8x512xf32>
      tpu.vector_store %arg15[%c56_131, %c0_132], %152 {strides = array<i32>} : memref<72x512xf32, #tpu.memory_space<vmem>>, vector<8x512xf32>,
      %c495_i32_133 = arith.constant 495 : i32
      %154 = tpu.dynamic_rotate %117 by %c495_i32_133 dim 1 : vector<8x512xf32>, i32 -> vector<8x512xf32>
      %c8_134 = arith.constant 8 : index
      %c0_135 = arith.constant 0 : index
      %155 = vector.load %arg3[%c8_134, %c0_135] : memref<9x512xf32, #tpu.memory_space<vmem>>, vector<1x512xf32>
      %156 = vector.broadcast %155 : vector<1x512xf32> to vector<8x512xf32>
      %157 = arith.mulf %154, %156 : vector<8x512xf32>
      %c64_136 = arith.constant 64 : index
      %c0_137 = arith.constant 0 : index
      %158 = vector.load %arg15[%c64_136, %c0_137] : memref<72x512xf32, #tpu.memory_space<vmem>>, vector<8x512xf32>
      tpu.vector_store %arg15[%c64_136, %c0_137], %157 {strides = array<i32>} : memref<72x512xf32, #tpu.memory_space<vmem>>, vector<8x512xf32>,
      %c0_138 = arith.constant 0 : index
      %c0_139 = arith.constant 0 : index
      %159 = vector.load %arg7[%c0_138, %c0_139] : memref<8x72xf32, #tpu.memory_space<vmem>>, vector<8x72xf32>
      %c0_140 = arith.constant 0 : index
      %c0_141 = arith.constant 0 : index
      %160 = vector.load %arg15[%c0_140, %c0_141] : memref<72x512xf32, #tpu.memory_space<vmem>>, vector<72x512xf32>
      %cst_142 = arith.constant dense<0.000000e+00> : vector<8x512xf32>
      %161 = tpu.matmul %159, %160, %cst_142 {dimension_numbers = #tpu.dot_dimension_numbers<[1], [0], [0], [1], [0, 0, 1, 1], [], []>} : vector<8x72xf32>, vector<72x512xf32>, vector<8x512xf32> -> vector<8x512xf32>
      %c0_143 = arith.constant 0 : index
      %c0_144 = arith.constant 0 : index
      %162 = vector.load %arg8[%c0_143, %c0_144] : memref<8x1xf32, #tpu.memory_space<vmem>>, vector<8x1xf32>
      %163 = vector.broadcast %162 : vector<8x1xf32> to vector<8x512xf32>
      %164 = arith.addf %161, %163 : vector<8x512xf32>
      %165 = math.tanh %164 : vector<8x512xf32>
      %c0_145 = arith.constant 0 : index
      %166 = memref.load %arg1[%c0_145] : memref<2xf32, #tpu.memory_space<smem>>
      %167 = vector.broadcast %166 : f32 to vector<8x512xf32>
      %168 = arith.mulf %165, %167 : vector<8x512xf32>
      %169 = arith.addf %0, %168 : vector<8x512xf32>
      %c0_146 = arith.constant 0 : index
      %c0_147 = arith.constant 0 : index
      %170 = vector.load %arg14[%c0_146, %c0_147] : memref<8x512xf32, #tpu.memory_space<vmem>>, vector<8x512xf32>
      tpu.vector_store %arg14[%c0_146, %c0_147], %169 {strides = array<i32>} : memref<8x512xf32, #tpu.memory_space<vmem>>, vector<8x512xf32>,
    } else {
    }
    %c1_1 = arith.constant 1 : index
    %5 = memref.load %arg1[%c1_1] : memref<2xf32, #tpu.memory_space<smem>>
    %cst_2 = arith.constant 5.000000e-01 : f32
    %6 = arith.cmpf ole, %5, %cst_2 : f32
    %7 = arith.extui %6 : i1 to i32
    %c0_i32_3 = arith.constant 0 : i32
    %8 = arith.cmpi ne, %7, %c0_i32_3 : i32
    scf.if %8 {
      %c0_46 = arith.constant 0 : index
      %c0_47 = arith.constant 0 : index
      %69 = vector.load %arg14[%c0_46, %c0_47] : memref<8x512xf32, #tpu.memory_space<vmem>>, vector<8x512xf32>
      tpu.vector_store %arg14[%c0_46, %c0_47], %0 {strides = array<i32>} : memref<8x512xf32, #tpu.memory_space<vmem>>, vector<8x512xf32>,
    } else {
    }
    %c0_4 = arith.constant 0 : index
    %c0_5 = arith.constant 0 : index
    %9 = vector.load %arg14[%c0_4, %c0_5] : memref<8x512xf32, #tpu.memory_space<vmem>>, vector<8x512xf32>
    %c17_i32 = arith.constant 17 : i32
    %10 = tpu.dynamic_rotate %9 by %c17_i32 dim 1 : vector<8x512xf32>, i32 -> vector<8x512xf32>
    %c0_6 = arith.constant 0 : index
    %c0_7 = arith.constant 0 : index
    %11 = vector.load %arg3[%c0_6, %c0_7] : memref<9x512xf32, #tpu.memory_space<vmem>>, vector<1x512xf32>
    %12 = vector.broadcast %11 : vector<1x512xf32> to vector<8x512xf32>
    %13 = arith.mulf %10, %12 : vector<8x512xf32>
    %c0_8 = arith.constant 0 : index
    %c0_9 = arith.constant 0 : index
    %14 = vector.load %arg15[%c0_8, %c0_9] : memref<72x512xf32, #tpu.memory_space<vmem>>, vector<8x512xf32>
    tpu.vector_store %arg15[%c0_8, %c0_9], %13 {strides = array<i32>} : memref<72x512xf32, #tpu.memory_space<vmem>>, vector<8x512xf32>,
    %c16_i32 = arith.constant 16 : i32
    %15 = tpu.dynamic_rotate %9 by %c16_i32 dim 1 : vector<8x512xf32>, i32 -> vector<8x512xf32>
    %c1_10 = arith.constant 1 : index
    %c0_11 = arith.constant 0 : index
    %16 = vector.load %arg3[%c1_10, %c0_11] : memref<9x512xf32, #tpu.memory_space<vmem>>, vector<1x512xf32>
    %17 = vector.broadcast %16 : vector<1x512xf32> to vector<8x512xf32>
    %18 = arith.mulf %15, %17 : vector<8x512xf32>
    %c8 = arith.constant 8 : index
    %c0_12 = arith.constant 0 : index
    %19 = vector.load %arg15[%c8, %c0_12] : memref<72x512xf32, #tpu.memory_space<vmem>>, vector<8x512xf32>
    tpu.vector_store %arg15[%c8, %c0_12], %18 {strides = array<i32>} : memref<72x512xf32, #tpu.memory_space<vmem>>, vector<8x512xf32>,
    %c15_i32 = arith.constant 15 : i32
    %20 = tpu.dynamic_rotate %9 by %c15_i32 dim 1 : vector<8x512xf32>, i32 -> vector<8x512xf32>
    %c2 = arith.constant 2 : index
    %c0_13 = arith.constant 0 : index
    %21 = vector.load %arg3[%c2, %c0_13] : memref<9x512xf32, #tpu.memory_space<vmem>>, vector<1x512xf32>
    %22 = vector.broadcast %21 : vector<1x512xf32> to vector<8x512xf32>
    %23 = arith.mulf %20, %22 : vector<8x512xf32>
    %c16 = arith.constant 16 : index
    %c0_14 = arith.constant 0 : index
    %24 = vector.load %arg15[%c16, %c0_14] : memref<72x512xf32, #tpu.memory_space<vmem>>, vector<8x512xf32>
    tpu.vector_store %arg15[%c16, %c0_14], %23 {strides = array<i32>} : memref<72x512xf32, #tpu.memory_space<vmem>>, vector<8x512xf32>,
    %c1_i32 = arith.constant 1 : i32
    %25 = tpu.dynamic_rotate %9 by %c1_i32 dim 1 : vector<8x512xf32>, i32 -> vector<8x512xf32>
    %c3 = arith.constant 3 : index
    %c0_15 = arith.constant 0 : index
    %26 = vector.load %arg3[%c3, %c0_15] : memref<9x512xf32, #tpu.memory_space<vmem>>, vector<1x512xf32>
    %27 = vector.broadcast %26 : vector<1x512xf32> to vector<8x512xf32>
    %28 = arith.mulf %25, %27 : vector<8x512xf32>
    %c24 = arith.constant 24 : index
    %c0_16 = arith.constant 0 : index
    %29 = vector.load %arg15[%c24, %c0_16] : memref<72x512xf32, #tpu.memory_space<vmem>>, vector<8x512xf32>
    tpu.vector_store %arg15[%c24, %c0_16], %28 {strides = array<i32>} : memref<72x512xf32, #tpu.memory_space<vmem>>, vector<8x512xf32>,
    %c32 = arith.constant 32 : index
    %c0_17 = arith.constant 0 : index
    %30 = vector.load %arg15[%c32, %c0_17] : memref<72x512xf32, #tpu.memory_space<vmem>>, vector<8x512xf32>
    tpu.vector_store %arg15[%c32, %c0_17], %9 {strides = array<i32>} : memref<72x512xf32, #tpu.memory_space<vmem>>, vector<8x512xf32>,
    %c511_i32 = arith.constant 511 : i32
    %31 = tpu.dynamic_rotate %9 by %c511_i32 dim 1 : vector<8x512xf32>, i32 -> vector<8x512xf32>
    %c5 = arith.constant 5 : index
    %c0_18 = arith.constant 0 : index
    %32 = vector.load %arg3[%c5, %c0_18] : memref<9x512xf32, #tpu.memory_space<vmem>>, vector<1x512xf32>
    %33 = vector.broadcast %32 : vector<1x512xf32> to vector<8x512xf32>
    %34 = arith.mulf %31, %33 : vector<8x512xf32>
    %c40 = arith.constant 40 : index
    %c0_19 = arith.constant 0 : index
    %35 = vector.load %arg15[%c40, %c0_19] : memref<72x512xf32, #tpu.memory_space<vmem>>, vector<8x512xf32>
    tpu.vector_store %arg15[%c40, %c0_19], %34 {strides = array<i32>} : memref<72x512xf32, #tpu.memory_space<vmem>>, vector<8x512xf32>,
    %c497_i32 = arith.constant 497 : i32
    %36 = tpu.dynamic_rotate %9 by %c497_i32 dim 1 : vector<8x512xf32>, i32 -> vector<8x512xf32>
    %c6 = arith.constant 6 : index
    %c0_20 = arith.constant 0 : index
    %37 = vector.load %arg3[%c6, %c0_20] : memref<9x512xf32, #tpu.memory_space<vmem>>, vector<1x512xf32>
    %38 = vector.broadcast %37 : vector<1x512xf32> to vector<8x512xf32>
    %39 = arith.mulf %36, %38 : vector<8x512xf32>
    %c48 = arith.constant 48 : index
    %c0_21 = arith.constant 0 : index
    %40 = vector.load %arg15[%c48, %c0_21] : memref<72x512xf32, #tpu.memory_space<vmem>>, vector<8x512xf32>
    tpu.vector_store %arg15[%c48, %c0_21], %39 {strides = array<i32>} : memref<72x512xf32, #tpu.memory_space<vmem>>, vector<8x512xf32>,
    %c496_i32 = arith.constant 496 : i32
    %41 = tpu.dynamic_rotate %9 by %c496_i32 dim 1 : vector<8x512xf32>, i32 -> vector<8x512xf32>
    %c7 = arith.constant 7 : index
    %c0_22 = arith.constant 0 : index
    %42 = vector.load %arg3[%c7, %c0_22] : memref<9x512xf32, #tpu.memory_space<vmem>>, vector<1x512xf32>
    %43 = vector.broadcast %42 : vector<1x512xf32> to vector<8x512xf32>
    %44 = arith.mulf %41, %43 : vector<8x512xf32>
    %c56 = arith.constant 56 : index
    %c0_23 = arith.constant 0 : index
    %45 = vector.load %arg15[%c56, %c0_23] : memref<72x512xf32, #tpu.memory_space<vmem>>, vector<8x512xf32>
    tpu.vector_store %arg15[%c56, %c0_23], %44 {strides = array<i32>} : memref<72x512xf32, #tpu.memory_space<vmem>>, vector<8x512xf32>,
    %c495_i32 = arith.constant 495 : i32
    %46 = tpu.dynamic_rotate %9 by %c495_i32 dim 1 : vector<8x512xf32>, i32 -> vector<8x512xf32>
    %c8_24 = arith.constant 8 : index
    %c0_25 = arith.constant 0 : index
    %47 = vector.load %arg3[%c8_24, %c0_25] : memref<9x512xf32, #tpu.memory_space<vmem>>, vector<1x512xf32>
    %48 = vector.broadcast %47 : vector<1x512xf32> to vector<8x512xf32>
    %49 = arith.mulf %46, %48 : vector<8x512xf32>
    %c64 = arith.constant 64 : index
    %c0_26 = arith.constant 0 : index
    %50 = vector.load %arg15[%c64, %c0_26] : memref<72x512xf32, #tpu.memory_space<vmem>>, vector<8x512xf32>
    tpu.vector_store %arg15[%c64, %c0_26], %49 {strides = array<i32>} : memref<72x512xf32, #tpu.memory_space<vmem>>, vector<8x512xf32>,
    %c0_27 = arith.constant 0 : index
    %c0_28 = arith.constant 0 : index
    %51 = vector.load %arg9[%c0_27, %c0_28] : memref<8x72xf32, #tpu.memory_space<vmem>>, vector<8x72xf32>
    %c0_29 = arith.constant 0 : index
    %c0_30 = arith.constant 0 : index
    %52 = vector.load %arg15[%c0_29, %c0_30] : memref<72x512xf32, #tpu.memory_space<vmem>>, vector<72x512xf32>
    %cst_31 = arith.constant dense<0.000000e+00> : vector<8x512xf32>
    %53 = tpu.matmul %51, %52, %cst_31 {dimension_numbers = #tpu.dot_dimension_numbers<[1], [0], [0], [1], [0, 0, 1, 1], [], []>} : vector<8x72xf32>, vector<72x512xf32>, vector<8x512xf32> -> vector<8x512xf32>
    %c0_32 = arith.constant 0 : index
    %c0_33 = arith.constant 0 : index
    %54 = vector.load %arg10[%c0_32, %c0_33] : memref<8x1xf32, #tpu.memory_space<vmem>>, vector<8x1xf32>
    %55 = vector.broadcast %54 : vector<8x1xf32> to vector<8x512xf32>
    %56 = arith.addf %53, %55 : vector<8x512xf32>
    %cst_34 = arith.constant 0.000000e+00 : f32
    %57 = vector.broadcast %cst_34 : f32 to vector<8x512xf32>
    %58 = arith.maximumf %56, %57 : vector<8x512xf32>
    %c0_35 = arith.constant 0 : index
    %c0_36 = arith.constant 0 : index
    %59 = vector.load %arg4[%c0_35, %c0_36] : memref<512x8xf32, #tpu.memory_space<vmem>>, vector<512x8xf32>
    %cst_37 = arith.constant dense<0.000000e+00> : vector<8x8xf32>
    %60 = tpu.matmul %58, %59, %cst_37 {dimension_numbers = #tpu.dot_dimension_numbers<[1], [0], [0], [1], [0, 0, 1, 1], [], []>} : vector<8x512xf32>, vector<512x8xf32>, vector<8x8xf32> -> vector<8x8xf32>
    %c0_38 = arith.constant 0 : index
    %c0_39 = arith.constant 0 : index
    %61 = vector.load %arg11[%c0_38, %c0_39] : memref<10x8xf32, #tpu.memory_space<vmem>>, vector<10x8xf32>
    %cst_40 = arith.constant dense<0.000000e+00> : vector<10x8xf32>
    %62 = tpu.matmul %61, %60, %cst_40 {dimension_numbers = #tpu.dot_dimension_numbers<[1], [0], [0], [1], [0, 0, 1, 1], [], []>} : vector<10x8xf32>, vector<8x8xf32>, vector<10x8xf32> -> vector<10x8xf32>
    %c0_41 = arith.constant 0 : index
    %c0_42 = arith.constant 0 : index
    %63 = vector.load %arg12[%c0_41, %c0_42] : memref<10x1xf32, #tpu.memory_space<vmem>>, vector<10x1xf32>
    %64 = vector.broadcast %63 : vector<10x1xf32> to vector<10x8xf32>
    %65 = arith.addf %62, %64 : vector<10x8xf32>
    %c0_43 = arith.constant 0 : index
    %c0_44 = arith.constant 0 : index
    %c0_45 = arith.constant 0 : index
    %66 = vector.load %arg13[%c0_43, %c0_44, %c0_45] : memref<1x10x8xf32, #tpu.memory_space<vmem>>, vector<1x10x8xf32>
    %67 = vector.shape_cast %66 : vector<1x10x8xf32> to vector<10x8xf32>
    %68 = vector.shape_cast %65 : vector<10x8xf32> to vector<1x10x8xf32>
    tpu.vector_store %arg13[%c0_43, %c0_44, %c0_45], %68 {strides = array<i32>} : memref<1x10x8xf32, #tpu.memory_space<vmem>>, vector<1x10x8xf32>,
    return
  }
  func.func @transform_0(%arg0: i32) -> i32 {
    %c0_i32 = arith.constant 0 : i32
    %c0_i32_0 = arith.constant 0 : i32
    return %c0_i32 : i32
  }
  func.func @transform_1(%arg0: i32) -> (i32, i32) {
    %c0_i32 = arith.constant 0 : i32
    %c0_i32_0 = arith.constant 0 : i32
    return %c0_i32, %arg0 : i32, i32
  }
  func.func @transform_2(%arg0: i32) -> (i32, i32) {
    %c0_i32 = arith.constant 0 : i32
    %c0_i32_0 = arith.constant 0 : i32
    %c0_i32_1 = arith.constant 0 : i32
    return %c0_i32, %c0_i32_0 : i32, i32
  }
  func.func @transform_3(%arg0: i32) -> (i32, i32) {
    %c0_i32 = arith.constant 0 : i32
    %c0_i32_0 = arith.constant 0 : i32
    %c0_i32_1 = arith.constant 0 : i32
    return %c0_i32, %c0_i32_0 : i32, i32
  }
  func.func @transform_4(%arg0: i32) -> (i32, i32) {
    %c0_i32 = arith.constant 0 : i32
    %c0_i32_0 = arith.constant 0 : i32
    %c0_i32_1 = arith.constant 0 : i32
    return %c0_i32, %c0_i32_0 : i32, i32
  }
  func.func @transform_5(%arg0: i32) -> (i32, i32) {
    %c0_i32 = arith.constant 0 : i32
    %c0_i32_0 = arith.constant 0 : i32
    %c0_i32_1 = arith.constant 0 : i32
    return %c0_i32, %c0_i32_0 : i32, i32
  }
  func.func @transform_6(%arg0: i32) -> (i32, i32) {
    %c0_i32 = arith.constant 0 : i32
    %c0_i32_0 = arith.constant 0 : i32
    %c0_i32_1 = arith.constant 0 : i32
    return %c0_i32, %c0_i32_0 : i32, i32
  }
  func.func @transform_7(%arg0: i32) -> (i32, i32) {
    %c0_i32 = arith.constant 0 : i32
    %c0_i32_0 = arith.constant 0 : i32
    %c0_i32_1 = arith.constant 0 : i32
    return %c0_i32, %c0_i32_0 : i32, i32
  }
  func.func @transform_8(%arg0: i32) -> (i32, i32) {
    %c0_i32 = arith.constant 0 : i32
    %c0_i32_0 = arith.constant 0 : i32
    %c0_i32_1 = arith.constant 0 : i32
    return %c0_i32, %c0_i32_0 : i32, i32
  }
  func.func @transform_9(%arg0: i32) -> (i32, i32) {
    %c0_i32 = arith.constant 0 : i32
    %c0_i32_0 = arith.constant 0 : i32
    %c0_i32_1 = arith.constant 0 : i32
    return %c0_i32, %c0_i32_0 : i32, i32
  }
  func.func @transform_10(%arg0: i32) -> (i32, i32) {
    %c0_i32 = arith.constant 0 : i32
    %c0_i32_0 = arith.constant 0 : i32
    %c0_i32_1 = arith.constant 0 : i32
    return %c0_i32, %c0_i32_0 : i32, i32
  }
  func.func @transform_11(%arg0: i32) -> (i32, i32) {
    %c0_i32 = arith.constant 0 : i32
    %c0_i32_0 = arith.constant 0 : i32
    %c0_i32_1 = arith.constant 0 : i32
    return %c0_i32, %c0_i32_0 : i32, i32
  }
  func.func @transform_12(%arg0: i32) -> (i32, i32, i32) {
    %c0_i32 = arith.constant 0 : i32
    %c0_i32_0 = arith.constant 0 : i32
    %c0_i32_1 = arith.constant 0 : i32
    return %arg0, %c0_i32, %c0_i32_0 : i32, i32, i32
  }
}

</mosaic_0001>

<bundles_post_ra>
// kernel: tpu_custom_call.1
= control target key start
LH: loop header
LB: loop body
LE: loop exit
PB: predicated region body
PF: predicated region fallthrough
CT: control target
= control target key end

     0   :  { %17 = vsyncpa [#allocation5], 0  ;;  %s3279_s0 = inlined_call_operand.vmem [shape: f32[2], index: 0, kind: input, shape index: {}]   ;;  %s3280_s1 = inlined_call_operand.vmem [shape: f32[8,512], index: 1, kind: input, shape index: {}]   ;;  %s3281_s2 = inlined_call_operand.vmem [shape: f32[9,512], index: 2, kind: input, shape index: {}]   ;;  %s3282_s3 = inlined_call_operand.vmem [shape: f32[512,8], index: 3, kind: input, shape index: {}]   ;;  %s3283_s4 = inlined_call_operand.vmem [shape: f32[8,72], index: 4, kind: input, shape index: {}]   ;;  %s3284_s5 = inlined_call_operand.vmem [shape: f32[8,1], index: 5, kind: input, shape index: {}]   ;;  %s3285_s6 = inlined_call_operand.vmem [shape: f32[8,72], index: 6, kind: input, shape index: {}]   ;;  %s3286_s7 = inlined_call_operand.vmem [shape: f32[8,1], index: 7, kind: input, shape index: {}]   ;;  %s3287_s8 = inlined_call_operand.vmem [shape: f32[8,72], index: 8, kind: input, shape index: {}]   ;;  %s3288_s9 = inlined_call_operand.vmem [shape: f32[8,1], index: 9, kind: input, shape index: {}]   ;;  %s3289_s10 = inlined_call_operand.vmem [shape: f32[10,8], index: 10, kind: input, shape index: {}]   ;;  %s3290_s11 = inlined_call_operand.vmem [shape: f32[10,1], index: 11, kind: input, shape index: {}]   ;;  %s3291_s12 = inlined_call_operand.vmem [shape: f32[1,10,8], index: 12, kind: output, shape index: {}]  }
   0x1   :  { %s24_s23 = sshll.u32 %s3279_s0, 4  ;;  %s25_s23 = int_to_ptr.vmem [resolvable:$true] %s24_s23 }
   0x2   :  { %s2331_s24 = scalar_lea.vmem %s25_s23, 16  ;;  %p2336_p1 = scmp.lt.s32.totalorder %s25_s23, %s25_s23 }
   0x3   :  { %p2332_p0 = scmp.ne.s32.totalorder %s25_s23, %s2331_s24  ;;  %p2337_p2 = scmp.lt.s32.totalorder %s2331_s24, %s2331_s24 }
   0x5   :  { %p2338_p3 = por %p2337_p2, %p2336_p1 }
   0x7   :  { %p2339_p4 = pnand %p2338_p3, %p2332_p0 }
   0x9   :  { %2342 = shalt.err (!%p2339_p4)
}
   0xa   :  { %s2345_s25 = smov [#allocation4]  }
   0xb   :  { %27 = dma.vmem_to_smem %s25_s23, 16, %s2345_s25, [#allocation5]  }
   0xc   :  { %2343 = dma.done.wait [#allocation5], 16  }
   0xd   :  { %2344 = vsyncadd [#allocation5], 4294967280 }
   0xe   :  { %53 = sfence }
   0xf   :  { %v2437_v0 = vld [vmem:[%s3280_s1] sm:$0xff]  ;;  %v2442_v1 = vld [vmem:[%s3280_s1 + $0x8] sm:$0xff]  ;;  %v2447_v2 = vld [vmem:[%s3280_s1 + $0x10] sm:$0xff]  ;;  %s2030_s13 = sld [smem:[#allocation4 + $0x1]] }
  0x10   :  { %v2452_v3 = vld [vmem:[%s3280_s1 + $0x18] sm:$0xff] }
  0x15   :  { %p59_p5 = scmp.gt.f32.partialorder %s2030_s13, 0.5 }
  0x16   :  { %s2346_s16 = smov (%p59_p5), 17   ;;  %s2347_s17 = smov (%p59_p5), 16   ;;  %v2353_v4 = vmov (%p59_p5), 0.0   ;;  %v2354_v5 = vmov (%p59_p5), 0   ;;  %v457_v6 = vld [vmem:[%s3284_s5] sm:$0xff] (%p59_p5)  ;;  %v71_v7 = vlaneseq (%p59_p5)  ;;  %vm463_vm8 = vcmask (%p59_p5), 588800  }
  0x17   :  { %62 = sbr.rel (!%p59_p5) target bundleno = 834 (0x342), region = 57  ;;  %67 = vrot.lane.b32.xlu1 (%p59_p5), %v2447_v2, %s2346_s16  ;;  %63 = vrot.lane.b32.xlu0 (%p59_p5), %v2437_v0, %s2346_s16  ;;  %s2348_s1 = smov (%p59_p5), 15   ;;  %v78_v13 = vld [vmem:[%s3281_s2] ss:$8 sm:$0xf] (%p59_p5) }
  0x18   :  { %s2349_s18 = smov (%p59_p5), 1   ;;  %s2350_s19 = smov (%p59_p5), 127   ;;  %531 = vmatprep.mubr.f32.mxu0 (%p59_p5), %v2353_v4  ;;  %602 = vmatprep.mubr.f32.mxu1 (%p59_p5), %v2353_v4  ;;  %v81_v8 = vshrl.u32 (%p59_p5), %v71_v7, 7  ;;  %v2523_v11 = vand.u32 (%p59_p5), 127, %v71_v7 }
  0x19   :  { %s2351_s20 = smov (%p59_p5), 113   ;;  %s2352_s21 = smov (%p59_p5), 112   ;;  %2320 = vset.pattern.permute.xlu0 (%p59_p5), %v2354_v5  ;;  %v2031_v14 = vld [vmem:[%s3281_s2 + $0x1] ss:$8 sm:$0xf] (%p59_p5) }
  0x1a   :  { %s2355_s22 = smov (%p59_p5), 111   ;;  %v2525_v12 = vsub.s32 (%p59_p5), 1, %v81_v8  ;;  %vm73_vm0 = vcmp.lt.s32.totalorder (%p59_p5), %v2523_v11, 17  ;;  %v2534_v15 = vsub.s32 (%p59_p5), 0, %v81_v8  ;;  %v2536_v16 = vsub.s32 (%p59_p5), 2, %v81_v8 }
  0x1b   :  { %69 = vrot.lane.b32.xlu1 (%p59_p5), %v2452_v3, %s2346_s16  ;;  %65 = vrot.lane.b32.xlu0 (%p59_p5), %v2442_v1, %s2346_s16  ;;  %v2538_v17 = vsub.s32 (%p59_p5), 3, %v81_v8  ;;  %vm116_vm1 = vcmp.lt.s32.totalorder (%p59_p5), %v2523_v11, 16  ;;  %v2032_v54 = vld [vmem:[%s3281_s2 + $0x2] ss:$8 sm:$0xf] (%p59_p5)  ;;  %vm160_vm2 = vcmp.lt.s32.totalorder (%p59_p5), %v2523_v11, 15 }
  0x1c   :  { %v87_v20 = vrot.slane (%p59_p5), %v78_v13, %v2525_v12  ;;  %v131_v21 = vrot.slane (%p59_p5), %v2031_v14, %v2525_v12  ;;  %v83_v23 = vrot.slane (%p59_p5), %v78_v13, %v2534_v15  ;;  %v91_v25 = vrot.slane (%p59_p5), %v78_v13, %v2536_v16  ;;  %v2033_v55 = vld [vmem:[%s3281_s2 + $0x3] ss:$8 sm:$0xf] (%p59_p5) }
  0x1d   :  { %v95_v24 = vrot.slane (%p59_p5), %v78_v13, %v2538_v17  ;;  %v127_v30 = vrot.slane (%p59_p5), %v2031_v14, %v2534_v15  ;;  %v135_v31 = vrot.slane (%p59_p5), %v2031_v14, %v2536_v16  ;;  %v139_v35 = vrot.slane (%p59_p5), %v2031_v14, %v2538_v17 }
  0x1e   :  { %v175_v58 = vrot.slane %v2032_v54, %v2525_v12  ;;  %vm204_vm3 = vcmp.lt.s32.totalorder %v2523_v11, 1  ;;  %v219_v59 = vrot.slane %v2033_v55, %v2525_v12  ;;  %v171_v61 = vrot.slane %v2032_v54, %v2534_v15 }
  0x1f   :  { %110 = vrot.lane.b32.xlu1 %v2442_v1, %s2347_s17  ;;  %108 = vrot.lane.b32.xlu0 %v2437_v0, %s2347_s17  ;;  %v179_v62 = vrot.slane %v2032_v54, %v2536_v16  ;;  %v183_v63 = vrot.slane %v2032_v54, %v2538_v17  ;;  %vm252_vm4 = vcmp.lt.s32.totalorder %v2523_v11, 127  ;;  %vm340_vm5 = vcmp.lt.s32.totalorder %v2523_v11, 112 }
  0x20   :  { %vm296_vm6 = vcmp.lt.s32.totalorder %v2523_v11, 113  ;;  %vm384_vm7 = vcmp.lt.s32.totalorder %v2523_v11, 111 }
  0x23   :  { %114 = vrot.lane.b32.xlu1 %v2452_v3, %s2347_s17  ;;  %112 = vrot.lane.b32.xlu0 %v2447_v2, %s2347_s17 }
  0x27   :  { %154 = vrot.lane.b32.xlu1 %v2442_v1, %s2348_s1  ;;  %152 = vrot.lane.b32.xlu0 %v2437_v0, %s2348_s1 }
  0x2b   :  { %158 = vrot.lane.b32.xlu1 %v2452_v3, %s2348_s1  ;;  %156 = vrot.lane.b32.xlu0 %v2447_v2, %s2348_s1 }
  0x2f   :  { %198 = vrot.lane.b32.xlu1 %v2442_v1, %s2349_s18  ;;  %196 = vrot.lane.b32.xlu0 %v2437_v0, %s2349_s18 }
  0x33   :  { %202 = vrot.lane.b32.xlu1 %v2452_v3, %s2349_s18  ;;  %200 = vrot.lane.b32.xlu0 %v2447_v2, %s2349_s18 }
  0x37   :  { %246 = vrot.lane.b32.xlu1 %v2442_v1, %s2350_s19  ;;  %244 = vrot.lane.b32.xlu0 %v2437_v0, %s2350_s19 }
  0x3b   :  { %250 = vrot.lane.b32.xlu1 %v2452_v3, %s2350_s19  ;;  %248 = vrot.lane.b32.xlu0 %v2447_v2, %s2350_s19 }
  0x3f   :  { %290 = vrot.lane.b32.xlu1 %v2442_v1, %s2351_s20  ;;  %288 = vrot.lane.b32.xlu0 %v2437_v0, %s2351_s20 }
  0x43   :  { %294 = vrot.lane.b32.xlu1 %v2452_v3, %s2351_s20  ;;  %292 = vrot.lane.b32.xlu0 %v2447_v2, %s2351_s20 }
  0x47   :  { %334 = vrot.lane.b32.xlu1 %v2442_v1, %s2352_s21  ;;  %332 = vrot.lane.b32.xlu0 %v2437_v0, %s2352_s21 }
  0x4b   :  { %338 = vrot.lane.b32.xlu1 %v2452_v3, %s2352_s21  ;;  %336 = vrot.lane.b32.xlu0 %v2447_v2, %s2352_s21 }
  0x4f   :  { %378 = vrot.lane.b32.xlu1 %v2442_v1, %s2355_s22  ;;  %376 = vrot.lane.b32.xlu0 %v2437_v0, %s2355_s22 }
  0x53   :  { %382 = vrot.lane.b32.xlu1 %v2452_v3, %s2355_s22  ;;  %380 = vrot.lane.b32.xlu0 %v2447_v2, %s2355_s22 }
  0x57   :  { %460 = vperm.xlu0 %2320, %v457_v6  }
  0x89   :  { %v68_v9 = vpop.permute.xlu1 %67  ;;  %v64_v10 = vpop.permute.xlu0 %63 }
  0x8d   :  { %v70_v18 = vpop.permute.xlu1 %69  ;;  %v66_v19 = vpop.permute.xlu0 %65 }
  0x8e   :  { %v76_v22 = vsel %vm73_vm0, %v64_v10, %v66_v19  ;;  %v77_v28 = vsel %vm73_vm0, %v70_v18, %v64_v10  ;;  %v74_v32 = vsel %vm73_vm0, %v68_v9, %v70_v18  ;;  %v75_v36 = vsel %vm73_vm0, %v66_v19, %v68_v9 }
  0x8f   :  { %v101_v33 = vmul.f32 %v87_v20, %v76_v22  ;;  %v100_v37 = vmul.f32 %v83_v23, %v77_v28  ;;  %v103_v41 = vmul.f32 %v95_v24, %v74_v32  ;;  %v102_v45 = vmul.f32 %v91_v25, %v75_v36 }
  0x90   :  { %v215_v9 = vrot.slane %v2033_v55, %v2534_v15  ;;  %v223_v10 = vrot.slane %v2033_v55, %v2536_v16  ;;  %v227_v19 = vrot.slane %v2033_v55, %v2538_v17 }
  0x91   :  { %v111_v26 = vpop.permute.xlu1 %110  ;;  %v109_v27 = vpop.permute.xlu0 %108 }
  0x92   :  { %v119_v29 = vsel %vm116_vm1, %v109_v27, %v111_v26 }
  0x93   :  { %v145_v34 = vmul.f32 %v131_v21, %v119_v29 }
  0x95   :  { %v115_v38 = vpop.permute.xlu1 %114  ;;  %v113_v39 = vpop.permute.xlu0 %112  ;;  %v2139_v40 = vpack.c.bf16 %v145_v34, %v101_v33  ;;  %v2034_v33 = vld [vmem:[%s3281_s2 + $0x5] ss:$8 sm:$0xf] }
  0x96   :  { %v120_v42 = vsel %vm116_vm1, %v115_v38, %v109_v27  ;;  %v117_v43 = vsel %vm116_vm1, %v113_v39, %v115_v38  ;;  %v118_v44 = vsel %vm116_vm1, %v111_v26, %v113_v39  ;;  %v263_v39 = vrot.slane %v2034_v33, %v2534_v15 }
  0x97   :  { %v144_v46 = vmul.f32 %v127_v30, %v120_v42  ;;  %v146_v47 = vmul.f32 %v135_v31, %v118_v44  ;;  %v147_v48 = vmul.f32 %v139_v35, %v117_v43  ;;  %2140 = vmatprep.subr.bf16.mxu0 %v2139_v40  ;;  %v275_v40 = vrot.slane %v2034_v33, %v2538_v17 }
  0x98   :  { %v267_v42 = vrot.slane %v2034_v33, %v2525_v12  ;;  %v271_v43 = vrot.slane %v2034_v33, %v2536_v16 }
  0x99   :  { %v155_v49 = vpop.permute.xlu1 %154  ;;  %v153_v50 = vpop.permute.xlu0 %152  ;;  %v2141_v51 = vpack.c.bf16 %v144_v46, %v100_v37  ;;  %v2155_v52 = vpack.c.bf16 %v147_v48, %v103_v41  ;;  %v2157_v53 = vpack.c.bf16 %v146_v47, %v102_v45 }
  0x9a   :  { %v163_v60 = vsel %vm160_vm2, %v153_v50, %v155_v49 }
  0x9b   :  { %2142 = vmatpush1.bf16.msra.mxu0 %v2141_v51  ;;  %2156 = vmatprep.subr.bf16.mxu1 %v2155_v52  ;;  %v189_v13 = vmul.f32 %v175_v58, %v163_v60 }
  0x9c   :  { %2158 = vmatpush1.bf16.msra.mxu1 %v2157_v53 }
  0x9d   :  { %v159_v56 = vpop.permute.xlu1 %158  ;;  %v157_v57 = vpop.permute.xlu0 %156 }
  0x9e   :  { %v164_v7 = vsel %vm160_vm2, %v159_v56, %v153_v50  ;;  %v162_v14 = vsel %vm160_vm2, %v155_v49, %v157_v57  ;;  %v161_v20 = vsel %vm160_vm2, %v157_v57, %v159_v56 }
  0x9f   :  { %v188_v21 = vmul.f32 %v171_v61, %v164_v7  ;;  %v190_v25 = vmul.f32 %v179_v62, %v162_v14  ;;  %v191_v29 = vmul.f32 %v183_v63, %v161_v20  ;;  %v2036_v61 = vld [vmem:[%s3281_s2 + $0x7] ss:$8 sm:$0xf]  ;;  %v2035_v62 = vld [vmem:[%s3281_s2 + $0x6] ss:$8 sm:$0xf] }
  0xa0   :  { %v319_v63 = vrot.slane %v2035_v62, %v2538_v17  ;;  %v359_v20 = vrot.slane %v2036_v61, %v2536_v16 }
  0xa1   :  { %v199_v5 = vpop.permute.xlu1 %198  ;;  %v197_v6 = vpop.permute.xlu0 %196 }
  0xa2   :  { %v207_v8 = vsel %vm204_vm3, %v197_v6, %v199_v5 }
  0xa3   :  { %v233_v18 = vmul.f32 %v219_v59, %v207_v8 }
  0xa5   :  { %v203_v22 = vpop.permute.xlu1 %202  ;;  %v201_v23 = vpop.permute.xlu0 %200  ;;  %v2143_v24 = vpack.c.bf16 %v233_v18, %v189_v13  ;;  %v351_v13 = vrot.slane %v2036_v61, %v2534_v15  ;;  %v363_v18 = vrot.slane %v2036_v61, %v2538_v17 }
  0xa6   :  { %v208_v26 = vsel %vm204_vm3, %v203_v22, %v197_v6  ;;  %v205_v27 = vsel %vm204_vm3, %v201_v23, %v203_v22  ;;  %v206_v28 = vsel %vm204_vm3, %v199_v5, %v201_v23  ;;  %v311_v5 = vrot.slane %v2035_v62, %v2525_v12 }
  0xa7   :  { %v232_v30 = vmul.f32 %v215_v9, %v208_v26  ;;  %v234_v31 = vmul.f32 %v223_v10, %v206_v28  ;;  %v235_v32 = vmul.f32 %v227_v19, %v205_v27  ;;  %2144 = vmatprep.subr.bf16.mxu0 %v2143_v24  ;;  %v315_v9 = vrot.slane %v2035_v62, %v2536_v16 }
  0xa8   :  { %v355_v19 = vrot.slane %v2036_v61, %v2525_v12 }
  0xa9   :  { %v247_v34 = vpop.permute.xlu1 %246  ;;  %v245_v35 = vpop.permute.xlu0 %244  ;;  %v2145_v36 = vpack.c.bf16 %v232_v30, %v188_v21  ;;  %v2159_v37 = vpack.c.bf16 %v235_v32, %v191_v29  ;;  %v2161_v38 = vpack.c.bf16 %v234_v31, %v190_v25  ;;  %v307_v21 = vrot.slane %v2035_v62, %v2534_v15 }
  0xaa   :  { %v255_v41 = vsel %vm252_vm4, %v245_v35, %v247_v34 }
  0xab   :  { %2146 = vmatpush1.bf16.msra.mxu0 %v2145_v36  ;;  %2160 = vmatprep.subr.bf16.mxu1 %v2159_v37  ;;  %v280_v46 = vmul.f32 %v263_v39, %v255_v41 }
  0xac   :  { %2162 = vmatpush1.bf16.msra.mxu1 %v2161_v38  ;;  %v2037_v38 = vld [vmem:[%s3281_s2 + $0x20] ss:$8 sm:$0xf] }
  0xad   :  { %v251_v44 = vpop.permute.xlu1 %250  ;;  %v249_v45 = vpop.permute.xlu0 %248  ;;  %v2149_v58 = vpack.c.bf16 %v280_v46, %v2437_v0  ;;  %v403_v46 = vrot.slane %v2037_v38, %v2536_v16 }
  0xae   :  { %v256_v47 = vsel %vm252_vm4, %v251_v44, %v245_v35  ;;  %v253_v48 = vsel %vm252_vm4, %v249_v45, %v251_v44  ;;  %v254_v49 = vsel %vm252_vm4, %v247_v34, %v249_v45  ;;  %v407_v44 = vrot.slane %v2037_v38, %v2538_v17 }
  0xaf   :  { %v283_v50 = vmul.f32 %v275_v40, %v256_v47  ;;  %v281_v51 = vmul.f32 %v267_v42, %v254_v49  ;;  %v282_v52 = vmul.f32 %v271_v43, %v253_v48  ;;  %v399_v45 = vrot.slane %v2037_v38, %v2525_v12 }
  0xb0   :  { %v395_v47 = vrot.slane %v2037_v38, %v2534_v15 }
  0xb1   :  { %v291_v53 = vpop.permute.xlu1 %290  ;;  %v289_v54 = vpop.permute.xlu0 %288  ;;  %v2147_v55 = vpack.c.bf16 %v281_v51, %v2442_v1  ;;  %v2163_v56 = vpack.c.bf16 %v283_v50, %v2452_v3  ;;  %v2165_v57 = vpack.c.bf16 %v282_v52, %v2447_v2 }
  0xb2   :  { %v299_v23 = vsel %vm296_vm6, %v289_v54, %v291_v53 }
  0xb3   :  { %2148 = vmatprep.subr.bf16.mxu0 %v2147_v55  ;;  %2164 = vmatprep.subr.bf16.mxu1 %v2163_v56  ;;  %v324_v36 = vmul.f32 %v307_v21, %v299_v23 }
  0xb4   :  { %2150 = vmatpush1.bf16.msra.mxu0 %v2149_v58  ;;  %2166 = vmatpush1.bf16.msra.mxu1 %v2165_v57  ;;  %v420_v58 = vld [vmem:[%s3283_s4] sm:$0xff] }
  0xb5   :  { %v295_v59 = vpop.permute.xlu1 %294  ;;  %v293_v60 = vpop.permute.xlu0 %292 }
  0xb6   :  { %v300_v8 = vsel %vm296_vm6, %v295_v59, %v289_v54  ;;  %v298_v10 = vsel %vm296_vm6, %v291_v53, %v293_v60  ;;  %v297_v22 = vsel %vm296_vm6, %v293_v60, %v295_v59 }
  0xb7   :  { %v327_v24 = vmul.f32 %v319_v63, %v300_v8  ;;  %v325_v25 = vmul.f32 %v311_v5, %v298_v10  ;;  %v326_v32 = vmul.f32 %v315_v9, %v297_v22 }
  0xb9   :  { %v335_v6 = vpop.permute.xlu1 %334  ;;  %v333_v7 = vpop.permute.xlu0 %332 }
  0xba   :  { %v343_v14 = vsel %vm340_vm5, %v333_v7, %v335_v6 }
  0xbb   :  { %v368_v28 = vmul.f32 %v351_v13, %v343_v14 }
  0xbd   :  { %v339_v26 = vpop.permute.xlu1 %338  ;;  %v337_v27 = vpop.permute.xlu0 %336  ;;  %v2153_v43 = vpack.c.bf16 %v368_v28, %v324_v36 }
  0xbe   :  { %v344_v29 = vsel %vm340_vm5, %v339_v26, %v333_v7  ;;  %v341_v30 = vsel %vm340_vm5, %v337_v27, %v339_v26  ;;  %v342_v31 = vsel %vm340_vm5, %v335_v6, %v337_v27 }
  0xbf   :  { %v371_v33 = vmul.f32 %v363_v18, %v344_v29  ;;  %v369_v34 = vmul.f32 %v355_v19, %v342_v31  ;;  %v370_v35 = vmul.f32 %v359_v20, %v341_v30  ;;  %v625_v18 = vld [vmem:[%s3281_s2] ss:$8 sm:$0xf]  ;;  %v2040_v31 = vld [vmem:[%s3281_s2 + $0x1] ss:$8 sm:$0xf] }
  0xc0   :  { %v634_v21 = vrot.slane %v625_v18, %v2525_v12  ;;  %v638_v22 = vrot.slane %v625_v18, %v2536_v16  ;;  %v630_v29 = vrot.slane %v625_v18, %v2534_v15  ;;  %v642_v30 = vrot.slane %v625_v18, %v2538_v17  ;;  %v2042_v18 = vld [vmem:[%s3281_s2 + $0x3] ss:$8 sm:$0xf] }
  0xc1   :  { %v379_v37 = vpop.permute.xlu1 %378  ;;  %v377_v39 = vpop.permute.xlu0 %376  ;;  %v2151_v40 = vpack.c.bf16 %v369_v34, %v325_v25  ;;  %v2167_v41 = vpack.c.bf16 %v371_v33, %v327_v24  ;;  %v2169_v42 = vpack.c.bf16 %v370_v35, %v326_v32  ;;  %v676_v38 = vrot.slane %v2040_v31, %v2525_v12 }
  0xc2   :  { %v387_v48 = vsel %vm384_vm7, %v377_v39, %v379_v37 }
  0xc3   :  { %2152 = vmatprep.subr.bf16.mxu0 %v2151_v40  ;;  %2168 = vmatprep.subr.bf16.mxu1 %v2167_v41  ;;  %v412_v57 = vmul.f32 %v395_v47, %v387_v48  ;;  %v684_v47 = vrot.slane %v2040_v31, %v2538_v17  ;;  %v2041_v48 = vld [vmem:[%s3281_s2 + $0x2] ss:$8 sm:$0xf] }
  0xc4   :  { %2154 = vmatpush1.bf16.msra.mxu0 %v2153_v43  ;;  %2170 = vmatpush1.bf16.msra.mxu1 %v2169_v42 }
  0xc5   :  { %v383_v49 = vpop.permute.xlu1 %382  ;;  %v381_v50 = vpop.permute.xlu0 %380 }
  0xc6   :  { %v388_v51 = vsel %vm384_vm7, %v383_v49, %v377_v39  ;;  %v385_v52 = vsel %vm384_vm7, %v381_v50, %v383_v49  ;;  %v386_v53 = vsel %vm384_vm7, %v379_v37, %v381_v50  ;;  %v680_v39 = vrot.slane %v2040_v31, %v2536_v16 }
  0xc7   :  { %v415_v54 = vmul.f32 %v407_v44, %v388_v51  ;;  %v413_v55 = vmul.f32 %v399_v45, %v386_v53  ;;  %v414_v56 = vmul.f32 %v403_v46, %v385_v52  ;;  %v672_v46 = vrot.slane %v2040_v31, %v2534_v15 }
  0xc9   :  { %483 = vmatprep.subr.mxu0 %v413_v55  ;;  %554 = vmatprep.subr.mxu1 %v415_v54 }
  0xca   :  { %484 = vmatpush1.msra.mxu0 %v412_v57  ;;  %555 = vmatpush1.msra.mxu1 %v414_v56  ;;  %v718_v56 = vrot.slane %v2041_v48, %v2525_v12  ;;  %v722_v57 = vrot.slane %v2041_v48, %v2536_v16 }
  0xcb   :  { %2038 = vmatmul.mubr.msk.f32.vlgmr.msra.gmra.mrb[0].mxu0 %vm463_vm8, %v420_v58  ;;  %2039 = vmatmul.mubr.msk.f32.vlgmr.msra.gmra.mrb[0].mxu1 %vm463_vm8, %v420_v58 }
  0xcc   :  { %1063 = vmatprep.mubr.f32.mxu0 %v2353_v4  ;;  %1134 = vmatprep.mubr.f32.mxu1 %v2353_v4  ;;  %v990_v4 = vld [vmem:[%s3286_s7] sm:$0xff] }
  0xd6   :  { %v461_v59 = vpop.permute.xlu0 %460 }
 0x19e   :  { %v533_v60 = vpop.f32.mrb[0].mxu0  ;;  %v604_v61 = vpop.f32.mrb[0].mxu1 }
 0x19f   :  { %v534_v62 = vadd.f32 %v533_v60, %v461_v59  ;;  %v605_v63 = vadd.f32 %v604_v61, %v461_v59  ;;  %v535_v5 = vpop.f32.mrb[1].mxu0  ;;  %v606_v6 = vpop.f32.mrb[1].mxu1 }
 0x1a0   :  { %v536_v7 = vadd.f32 %v535_v5, %v461_v59  ;;  %v607_v8 = vadd.f32 %v606_v6, %v461_v59  ;;  %v714_v5 = vrot.slane %v2041_v48, %v2534_v15 }
 0x1a1   :  { %v2672_v9 = vmax.f32 %v534_v62, 0.0  ;;  %v2674_v10 = vmax.f32 %v605_v63, 0.0 }
 0x1a2   :  { %v2676_v13 = vmax.f32 %v536_v7, 0.0  ;;  %v2678_v14 = vmax.f32 %v607_v8, 0.0 }
 0x1a3   :  { %617 = vrot.lane.b32.xlu0 %v2674_v10, %s2346_s16  ;;  %613 = vrot.lane.b32.xlu1 %v2672_v9, %s2346_s16 }
 0x1a7   :  { %655 = vrot.lane.b32.xlu0 %v2672_v9, %s2347_s17  ;;  %615 = vrot.lane.b32.xlu1 %v2676_v13, %s2346_s16 }
 0x1ab   :  { %659 = vrot.lane.b32.xlu0 %v2674_v10, %s2347_s17  ;;  %619 = vrot.lane.b32.xlu1 %v2678_v14, %s2346_s16 }
 0x1af   :  { %697 = vrot.lane.b32.xlu0 %v2672_v9, %s2348_s1  ;;  %657 = vrot.lane.b32.xlu1 %v2676_v13, %s2347_s17 }
 0x1b3   :  { %701 = vrot.lane.b32.xlu0 %v2674_v10, %s2348_s1  ;;  %661 = vrot.lane.b32.xlu1 %v2678_v14, %s2347_s17 }
 0x1b7   :  { %739 = vrot.lane.b32.xlu0 %v2672_v9, %s2349_s18  ;;  %699 = vrot.lane.b32.xlu1 %v2676_v13, %s2348_s1 }
 0x1bb   :  { %743 = vrot.lane.b32.xlu0 %v2674_v10, %s2349_s18  ;;  %703 = vrot.lane.b32.xlu1 %v2678_v14, %s2348_s1 }
 0x1bf   :  { %785 = vrot.lane.b32.xlu0 %v2672_v9, %s2350_s19  ;;  %741 = vrot.lane.b32.xlu1 %v2676_v13, %s2349_s18 }
 0x1c3   :  { %789 = vrot.lane.b32.xlu0 %v2674_v10, %s2350_s19  ;;  %745 = vrot.lane.b32.xlu1 %v2678_v14, %s2349_s18 }
 0x1c7   :  { %827 = vrot.lane.b32.xlu0 %v2672_v9, %s2351_s20  ;;  %787 = vrot.lane.b32.xlu1 %v2676_v13, %s2350_s19 }
 0x1cb   :  { %831 = vrot.lane.b32.xlu0 %v2674_v10, %s2351_s20  ;;  %791 = vrot.lane.b32.xlu1 %v2678_v14, %s2350_s19 }
 0x1cf   :  { %869 = vrot.lane.b32.xlu0 %v2672_v9, %s2352_s21  ;;  %829 = vrot.lane.b32.xlu1 %v2676_v13, %s2351_s20 }
 0x1d3   :  { %873 = vrot.lane.b32.xlu0 %v2674_v10, %s2352_s21  ;;  %833 = vrot.lane.b32.xlu1 %v2678_v14, %s2351_s20 }
 0x1d7   :  { %911 = vrot.lane.b32.xlu0 %v2672_v9, %s2355_s22  ;;  %871 = vrot.lane.b32.xlu1 %v2676_v13, %s2352_s21 }
 0x1db   :  { %915 = vrot.lane.b32.xlu0 %v2674_v10, %s2355_s22  ;;  %875 = vrot.lane.b32.xlu1 %v2678_v14, %s2352_s21 }
 0x1df   :  { %993 = vperm.xlu0 %2320, %v990_v4   ;;  %913 = vrot.lane.b32.xlu1 %v2676_v13, %s2355_s22  ;;  %v726_v4 = vrot.slane %v2041_v48, %v2538_v17 }
 0x1e3   :  { %917 = vrot.lane.b32.xlu1 %v2678_v14, %s2355_s22 }
 0x215   :  { %v618_v19 = vpop.permute.xlu0 %617  ;;  %v614_v20 = vpop.permute.xlu1 %613 }
 0x219   :  { %v656_v23 = vpop.permute.xlu0 %655  ;;  %v616_v24 = vpop.permute.xlu1 %615 }
 0x21a   :  { %v622_v25 = vsel %vm73_vm0, %v616_v24, %v618_v19  ;;  %v623_v26 = vsel %vm73_vm0, %v614_v20, %v616_v24 }
 0x21b   :  { %v648_v27 = vmul.f32 %v634_v21, %v623_v26  ;;  %v649_v28 = vmul.f32 %v638_v22, %v622_v25  ;;  %v760_v25 = vrot.slane %v2042_v18, %v2525_v12  ;;  %v764_v26 = vrot.slane %v2042_v18, %v2536_v16 }
 0x21d   :  { %v660_v32 = vpop.permute.xlu0 %659  ;;  %v620_v33 = vpop.permute.xlu1 %619 }
 0x21e   :  { %v621_v34 = vsel %vm73_vm0, %v618_v19, %v620_v33  ;;  %v624_v35 = vsel %vm73_vm0, %v620_v33, %v614_v20  ;;  %v756_v33 = vrot.slane %v2042_v18, %v2534_v15 }
 0x21f   :  { %v647_v36 = vmul.f32 %v630_v29, %v624_v35  ;;  %v650_v37 = vmul.f32 %v642_v30, %v621_v34  ;;  %v768_v34 = vrot.slane %v2042_v18, %v2538_v17  ;;  %v2043_v35 = vld [vmem:[%s3281_s2 + $0x5] ss:$8 sm:$0xf] }
 0x221   :  { %v698_v40 = vpop.permute.xlu0 %697  ;;  %v658_v41 = vpop.permute.xlu1 %657 }
 0x222   :  { %v664_v42 = vsel %vm116_vm1, %v658_v41, %v660_v32  ;;  %v665_v43 = vsel %vm116_vm1, %v656_v23, %v658_v41 }
 0x223   :  { %v690_v44 = vmul.f32 %v676_v38, %v665_v43  ;;  %v691_v45 = vmul.f32 %v680_v39, %v664_v42  ;;  %v802_v43 = vrot.slane %v2043_v35, %v2534_v15 }
 0x225   :  { %v702_v49 = vpop.permute.xlu0 %701  ;;  %v662_v50 = vpop.permute.xlu1 %661  ;;  %v2171_v51 = vpack.c.bf16 %v690_v44, %v648_v27  ;;  %v2189_v6 = vpack.c.bf16 %v691_v45, %v649_v28  ;;  %v806_v44 = vrot.slane %v2043_v35, %v2525_v12 }
 0x226   :  { %v663_v52 = vsel %vm116_vm1, %v660_v32, %v662_v50  ;;  %v666_v53 = vsel %vm116_vm1, %v662_v50, %v656_v23 }
 0x227   :  { %v689_v54 = vmul.f32 %v672_v46, %v666_v53  ;;  %v692_v55 = vmul.f32 %v684_v47, %v663_v52  ;;  %2172 = vmatprep.subr.bf16.mxu0 %v2171_v51  ;;  %v810_v51 = vrot.slane %v2043_v35, %v2536_v16 }
 0x229   :  { %v740_v58 = vpop.permute.xlu0 %739  ;;  %v700_v59 = vpop.permute.xlu1 %699  ;;  %v2173_v60 = vpack.c.bf16 %v689_v54, %v647_v36  ;;  %v2187_v61 = vpack.c.bf16 %v692_v55, %v650_v37  ;;  %v814_v55 = vrot.slane %v2043_v35, %v2538_v17 }
 0x22a   :  { %v706_v62 = vsel %vm160_vm2, %v700_v59, %v702_v49  ;;  %v707_v63 = vsel %vm160_vm2, %v698_v40, %v700_v59 }
 0x22b   :  { %v732_v7 = vmul.f32 %v718_v56, %v707_v63  ;;  %v733_v8 = vmul.f32 %v722_v57, %v706_v62  ;;  %2174 = vmatpush1.bf16.msra.mxu0 %v2173_v60  ;;  %2188 = vmatprep.subr.bf16.mxu1 %v2187_v61  ;;  %v2044_v56 = vld [vmem:[%s3281_s2 + $0x6] ss:$8 sm:$0xf] }
 0x22c   :  { %2190 = vmatpush1.bf16.msra.mxu1 %v2189_v6  ;;  %v844_v6 = vrot.slane %v2044_v56, %v2534_v15 }
 0x22d   :  { %v744_v19 = vpop.permute.xlu0 %743  ;;  %v704_v20 = vpop.permute.xlu1 %703 }
 0x22e   :  { %v705_v21 = vsel %vm160_vm2, %v702_v49, %v704_v20  ;;  %v708_v22 = vsel %vm160_vm2, %v704_v20, %v698_v40 }
 0x22f   :  { %v731_v23 = vmul.f32 %v714_v5, %v708_v22  ;;  %v734_v24 = vmul.f32 %v726_v4, %v705_v21  ;;  %v852_v22 = vrot.slane %v2044_v56, %v2536_v16 }
 0x231   :  { %v786_v27 = vpop.permute.xlu0 %785  ;;  %v742_v28 = vpop.permute.xlu1 %741 }
 0x232   :  { %v748_v29 = vsel %vm204_vm3, %v742_v28, %v744_v19  ;;  %v749_v30 = vsel %vm204_vm3, %v740_v58, %v742_v28 }
 0x233   :  { %v774_v31 = vmul.f32 %v760_v25, %v749_v30  ;;  %v775_v32 = vmul.f32 %v764_v26, %v748_v29 }
 0x235   :  { %v790_v36 = vpop.permute.xlu0 %789  ;;  %v746_v37 = vpop.permute.xlu1 %745  ;;  %v2175_v38 = vpack.c.bf16 %v774_v31, %v732_v7  ;;  %v2193_v52 = vpack.c.bf16 %v775_v32, %v733_v8  ;;  %v848_v7 = vrot.slane %v2044_v56, %v2525_v12 }
 0x236   :  { %v747_v39 = vsel %vm204_vm3, %v744_v19, %v746_v37  ;;  %v750_v40 = vsel %vm204_vm3, %v746_v37, %v740_v58 }
 0x237   :  { %v773_v41 = vmul.f32 %v756_v33, %v750_v40  ;;  %v776_v42 = vmul.f32 %v768_v34, %v747_v39  ;;  %2176 = vmatprep.subr.bf16.mxu0 %v2175_v38  ;;  %v2046_v39 = vld [vmem:[%s3281_s2 + $0x20] ss:$8 sm:$0xf] }
 0x239   :  { %v828_v45 = vpop.permute.xlu0 %827  ;;  %v788_v46 = vpop.permute.xlu1 %787  ;;  %v2177_v47 = vpack.c.bf16 %v773_v41, %v731_v23  ;;  %v2191_v48 = vpack.c.bf16 %v776_v42, %v734_v24  ;;  %v856_v23 = vrot.slane %v2044_v56, %v2538_v17  ;;  %v2045_v24 = vld [vmem:[%s3281_s2 + $0x7] ss:$8 sm:$0xf] }
 0x23a   :  { %v794_v49 = vsel %vm252_vm4, %v788_v46, %v790_v36  ;;  %v795_v50 = vsel %vm252_vm4, %v786_v27, %v788_v46  ;;  %v886_v29 = vrot.slane %v2045_v24, %v2534_v15  ;;  %v890_v30 = vrot.slane %v2045_v24, %v2525_v12 }
 0x23b   :  { %v819_v53 = vmul.f32 %v802_v43, %v795_v50  ;;  %v820_v54 = vmul.f32 %v806_v44, %v794_v49  ;;  %2178 = vmatpush1.bf16.msra.mxu0 %v2177_v47  ;;  %2192 = vmatprep.subr.bf16.mxu1 %v2191_v48  ;;  %v894_v37 = vrot.slane %v2045_v24, %v2536_v16 }
 0x23c   :  { %2194 = vmatpush1.bf16.msra.mxu1 %v2193_v52  ;;  %v898_v38 = vrot.slane %v2045_v24, %v2538_v17  ;;  %v928_v47 = vrot.slane %v2046_v39, %v2534_v15  ;;  %v932_v48 = vrot.slane %v2046_v39, %v2525_v12  ;;  %v940_v15 = vrot.slane %v2046_v39, %v2538_v17  ;;  %v953_v12 = vld [vmem:[%s3285_s6] sm:$0xff]  ;;  %s1145_s6 = sld [smem:[#allocation4]] }
 0x23d   :  { %v832_v57 = vpop.permute.xlu0 %831  ;;  %v792_v58 = vpop.permute.xlu1 %791  ;;  %v2179_v59 = vpack.c.bf16 %v820_v54, %v2676_v13  ;;  %v2181_v60 = vpack.c.bf16 %v819_v53, %v2672_v9 }
 0x23e   :  { %v793_v61 = vsel %vm252_vm4, %v790_v36, %v792_v58  ;;  %v796_v62 = vsel %vm252_vm4, %v792_v58, %v786_v27 }
 0x23f   :  { %v821_v63 = vmul.f32 %v810_v51, %v793_v61  ;;  %v822_v5 = vmul.f32 %v814_v55, %v796_v62  ;;  %2180 = vmatprep.subr.bf16.mxu0 %v2179_v59 }
 0x240   :  { %2182 = vmatpush1.bf16.msra.mxu0 %v2181_v60 }
 0x241   :  { %v870_v8 = vpop.permute.xlu0 %869  ;;  %v830_v4 = vpop.permute.xlu1 %829  ;;  %v2195_v13 = vpack.c.bf16 %v822_v5, %v2678_v14  ;;  %v2197_v9 = vpack.c.bf16 %v821_v63, %v2674_v10 }
 0x242   :  { %v836_v18 = vsel %vm296_vm6, %v830_v4, %v832_v57  ;;  %v837_v19 = vsel %vm296_vm6, %v828_v45, %v830_v4 }
 0x243   :  { %v861_v20 = vmul.f32 %v844_v6, %v837_v19  ;;  %v862_v21 = vmul.f32 %v848_v7, %v836_v18  ;;  %2196 = vmatprep.subr.bf16.mxu1 %v2195_v13  ;;  %v1146_v13 = vstv %s1145_s6 }
 0x244   :  { %2198 = vmatpush1.bf16.msra.mxu1 %v2197_v9 }
 0x245   :  { %v874_v14 = vpop.permute.xlu0 %873  ;;  %v834_v10 = vpop.permute.xlu1 %833 }
 0x246   :  { %v835_v25 = vsel %vm296_vm6, %v832_v57, %v834_v10  ;;  %v838_v26 = vsel %vm296_vm6, %v834_v10, %v828_v45  ;;  %v936_v57 = vrot.slane %v2046_v39, %v2536_v16 }
 0x247   :  { %v863_v27 = vmul.f32 %v852_v22, %v835_v25  ;;  %v864_v28 = vmul.f32 %v856_v23, %v838_v26 }
 0x249   :  { %v872_v31 = vpop.permute.xlu1 %871  ;;  %v912_v34 = vpop.permute.xlu0 %911 }
 0x24a   :  { %v878_v32 = vsel %vm340_vm5, %v872_v31, %v874_v14  ;;  %v879_v33 = vsel %vm340_vm5, %v870_v8, %v872_v31 }
 0x24b   :  { %v903_v35 = vmul.f32 %v886_v29, %v879_v33  ;;  %v904_v36 = vmul.f32 %v890_v30, %v878_v32 }
 0x24d   :  { %v876_v40 = vpop.permute.xlu1 %875  ;;  %v2183_v41 = vpack.c.bf16 %v904_v36, %v862_v21  ;;  %v2185_v42 = vpack.c.bf16 %v903_v35, %v861_v20  ;;  %v916_v49 = vpop.permute.xlu0 %915 }
 0x24e   :  { %v877_v43 = vsel %vm340_vm5, %v874_v14, %v876_v40  ;;  %v880_v44 = vsel %vm340_vm5, %v876_v40, %v870_v8 }
 0x24f   :  { %v905_v45 = vmul.f32 %v894_v37, %v877_v43  ;;  %v906_v46 = vmul.f32 %v898_v38, %v880_v44  ;;  %2184 = vmatprep.subr.bf16.mxu0 %v2183_v41 }
 0x250   :  { %2186 = vmatpush1.bf16.msra.mxu0 %v2185_v42 }
 0x251   :  { %v914_v50 = vpop.permute.xlu1 %913  ;;  %v2199_v51 = vpack.c.bf16 %v906_v46, %v864_v28  ;;  %v2201_v52 = vpack.c.bf16 %v905_v45, %v863_v27 }
 0x252   :  { %v920_v53 = vsel %vm384_vm7, %v914_v50, %v916_v49  ;;  %v921_v54 = vsel %vm384_vm7, %v912_v34, %v914_v50 }
 0x253   :  { %v945_v55 = vmul.f32 %v928_v47, %v921_v54  ;;  %v946_v56 = vmul.f32 %v932_v48, %v920_v53  ;;  %2200 = vmatprep.subr.bf16.mxu1 %v2199_v51 }
 0x254   :  { %2202 = vmatpush1.bf16.msra.mxu1 %v2201_v52 }
 0x255   :  { %v918_v58 = vpop.permute.xlu1 %917  ;;  %1015 = vmatprep.subr.mxu0 %v946_v56 }
 0x256   :  { %v919_v59 = vsel %vm384_vm7, %v916_v49, %v918_v58  ;;  %v922_v60 = vsel %vm384_vm7, %v918_v58, %v912_v34  ;;  %1016 = vmatpush1.msra.mxu0 %v945_v55 }
 0x257   :  { %v947_v61 = vmul.f32 %v936_v57, %v919_v59  ;;  %v948_v62 = vmul.f32 %v940_v15, %v922_v60  ;;  %2047 = vmatmul.mubr.msk.f32.vlgmr.msra.gmra.mrb[2].mxu0 %vm463_vm8, %v953_v12 }
 0x259   :  { %1086 = vmatprep.subr.mxu1 %v948_v62 }
 0x25a   :  { %1087 = vmatpush1.msra.mxu1 %v947_v61 }
 0x25b   :  { %2048 = vmatmul.mubr.msk.f32.vlgmr.msra.gmra.mrb[2].mxu1 %vm463_vm8, %v953_v12 }
 0x25e   :  { %v994_v16 = vpop.permute.xlu0 %993 }
 0x32a   :  { %v1065_v17 = vpop.f32.mrb[2].mxu0 }
 0x32b   :  { %v1066_v63 = vadd.f32 %v1065_v17, %v994_v16  ;;  %v1067_v5 = vpop.f32.mrb[3].mxu0 }
 0x32c   :  { %v1068_v6 = vadd.f32 %v1067_v5, %v994_v16 }
 0x32d   :  { %2321 = vtanh.f32 %v1066_v63 }
 0x32e   :  { %2323 = vtanh.f32 %v1068_v6  ;;  %v1136_v7 = vpop.f32.mrb[2].mxu1 }
 0x32f   :  { %v1137_v11 = vadd.f32 %v1136_v7, %v994_v16  ;;  %v1138_v8 = vpop.f32.mrb[3].mxu1 }
 0x330   :  { %v1139_v4 = vadd.f32 %v1138_v8, %v994_v16 }
 0x331   :  { %2325 = vtanh.f32 %v1137_v11 }
 0x332   :  { %2327 = vtanh.f32 %v1139_v4 }
 0x337   :  { %v2322_v9 = vpop.eup %2321 }
 0x338   :  { %v2324_v18 = vpop.eup %2323  ;;  %v1147_v19 = vmul.f32 %v2322_v9, %v1146_v13 }
 0x339   :  { %v1148_v20 = vmul.f32 %v2324_v18, %v1146_v13 }
 0x33a   :  { %v1151_v21 = vadd.f32 %v1147_v19, %v2437_v0 }
 0x33b   :  { %v2326_v22 = vpop.eup %2325  ;;  %v1152_v23 = vadd.f32 %v1148_v20, %v2442_v1 }
 0x33c   :  { %v2328_v24 = vpop.eup %2327  ;;  %1155 = vst [vmem:[#allocation2] sm:$0xff] %v1151_v21  ;;  %v1149_v14 = vmul.f32 %v2326_v22, %v1146_v13 }
 0x33d   :  { %1156 = vst [vmem:[#allocation2 + $0x8] sm:$0xff] %v1152_v23  ;;  %v1150_v10 = vmul.f32 %v2328_v24, %v1146_v13 }
 0x33e   :  { %v1153_v25 = vadd.f32 %v1149_v14, %v2447_v2 }
 0x33f   :  { %v1154_v26 = vadd.f32 %v1150_v10, %v2452_v3 }
 0x340   :  { %1157 = vst [vmem:[#allocation2 + $0x10] sm:$0xff] %v1153_v25 }
 0x341   :  { %1158 = vst [vmem:[#allocation2 + $0x18] sm:$0xff] %v1154_v26 }
 0x342 PF:  { %s2049_s27 = sld [smem:[#allocation4 + $0x1]] }
 0x348   :  { %p1160_p6 = scmp.le.f32.partialorder %s2049_s27, 0.5 }
 0x349   :  { %1164 = vst [vmem:[#allocation2] sm:$0xff] (%p1160_p6), %v2437_v0  ;;  %1165 = vst [vmem:[#allocation2 + $0x8] sm:$0xff] (%p1160_p6), %v2442_v1 }
 0x34a   :  { %1163 = sbr.rel (!%p1160_p6) target bundleno = 849 (0x351), region = 61  ;;  %1166 = vst [vmem:[#allocation2 + $0x10] sm:$0xff] (%p1160_p6), %v2447_v2  ;;  %1167 = vst [vmem:[#allocation2 + $0x18] sm:$0xff] (%p1160_p6), %v2452_v3 }
 0x351 PF:  { %v2884_v27 = vld [vmem:[#allocation2 + $0x10] sm:$0xff]  ;;  %v2886_v28 = vld [vmem:[#allocation2] sm:$0xff]  ;;  %v2888_v29 = vld [vmem:[#allocation2 + $0x18] sm:$0xff]  ;;  %s2356_s28 = smov 17   ;;  %s2357_s5 = smov 16   ;;  %v2363_v0 = vmov 0.0   ;;  %v1180_v3 = vlaneseq }
 0x352   :  { %1176 = vrot.lane.b32.xlu1 %v2884_v27, %s2356_s28  ;;  %1172 = vrot.lane.b32.xlu0 %v2886_v28, %s2356_s28  ;;  %v2892_v30 = vld [vmem:[#allocation2 + $0x8] sm:$0xff]  ;;  %s2358_s4 = smov 15   ;;  %s2359_s16 = smov 1   ;;  %v2364_v1 = vmov 0   ;;  %v1566_v2 = vld [vmem:[%s3288_s9] sm:$0xff]  ;;  %vm1572_vm1 = vcmask 588800  }
 0x353   :  { %s2360_s17 = smov 127   ;;  %s2361_s1 = smov 113   ;;  %1640 = vmatprep.mubr.f32.mxu0 %v2363_v0  ;;  %1711 = vmatprep.mubr.f32.mxu1 %v2363_v0  ;;  %v1190_v31 = vshrl.u32 %v1180_v3, 7  ;;  %v2927_v32 = vand.u32 127, %v1180_v3  ;;  %vm1940_vm2 = vcmask 64512   ;;  %vm2023_vm3 = vcmask 58368  }
 0x354   :  { %s2362_s7 = smov 112   ;;  %2329 = vset.pattern.permute.xlu0 %v2364_v1  ;;  %2330 = vset.pattern.permute.xlu1 %v2364_v1  ;;  %s2365_s18 = smov 111   ;;  %v1187_v37 = vld [vmem:[%s3281_s2] ss:$8 sm:$0xf] }
 0x355   :  { %v2929_v33 = vsub.s32 0, %v1190_v31  ;;  %v2931_v34 = vsub.s32 3, %v1190_v31  ;;  %v2933_v35 = vsub.s32 1, %v1190_v31  ;;  %v2935_v36 = vsub.s32 2, %v1190_v31 }
 0x356   :  { %1178 = vrot.lane.b32.xlu1 %v2888_v29, %s2356_s28  ;;  %1174 = vrot.lane.b32.xlu0 %v2892_v30, %s2356_s28  ;;  %vm1182_vm9 = vcmp.lt.s32.totalorder %v2927_v32, 17  ;;  %v2050_v40 = vld [vmem:[%s3281_s2 + $0x1] ss:$8 sm:$0xf]  ;;  %vm1225_vm10 = vcmp.lt.s32.totalorder %v2927_v32, 16  ;;  %vm1269_vm11 = vcmp.lt.s32.totalorder %v2927_v32, 15 }
 0x357   :  { %v1192_v41 = vrot.slane %v1187_v37, %v2929_v33  ;;  %v1204_v42 = vrot.slane %v1187_v37, %v2931_v34  ;;  %v1196_v43 = vrot.slane %v1187_v37, %v2933_v35  ;;  %v1200_v44 = vrot.slane %v1187_v37, %v2935_v36  ;;  %v2051_v61 = vld [vmem:[%s3281_s2 + $0x2] ss:$8 sm:$0xf]  ;;  %v2052_v10 = vld [vmem:[%s3281_s2 + $0x3] ss:$8 sm:$0xf] }
 0x358   :  { %v1240_v47 = vrot.slane %v2050_v40, %v2933_v35  ;;  %v1236_v58 = vrot.slane %v2050_v40, %v2929_v33  ;;  %v1244_v59 = vrot.slane %v2050_v40, %v2935_v36  ;;  %v1248_v60 = vrot.slane %v2050_v40, %v2931_v34 }
 0x359   :  { %v1284_v4 = vrot.slane %v2051_v61, %v2933_v35  ;;  %v1280_v22 = vrot.slane %v2051_v61, %v2929_v33  ;;  %v1288_v24 = vrot.slane %v2051_v61, %v2935_v36  ;;  %v1292_v14 = vrot.slane %v2051_v61, %v2931_v34 }
 0x35a   :  { %1219 = vrot.lane.b32.xlu1 %v2892_v30, %s2357_s5  ;;  %1217 = vrot.lane.b32.xlu0 %v2886_v28, %s2357_s5  ;;  %vm1313_vm12 = vcmp.lt.s32.totalorder %v2927_v32, 1  ;;  %vm1361_vm13 = vcmp.lt.s32.totalorder %v2927_v32, 127  ;;  %vm1405_vm14 = vcmp.lt.s32.totalorder %v2927_v32, 113  ;;  %vm1449_vm15 = vcmp.lt.s32.totalorder %v2927_v32, 112 }
 0x35b   :  { %vm1493_vm0 = vcmp.lt.s32.totalorder %v2927_v32, 111  ;;  %v1741_v32 = vld [vmem:[%s3282_s3 + $0x98] sm:$0xff] }
 0x35e   :  { %1223 = vrot.lane.b32.xlu1 %v2888_v29, %s2357_s5  ;;  %1221 = vrot.lane.b32.xlu0 %v2884_v27, %s2357_s5 }
 0x362   :  { %1263 = vrot.lane.b32.xlu1 %v2892_v30, %s2358_s4  ;;  %1261 = vrot.lane.b32.xlu0 %v2886_v28, %s2358_s4 }
 0x366   :  { %1267 = vrot.lane.b32.xlu1 %v2888_v29, %s2358_s4  ;;  %1265 = vrot.lane.b32.xlu0 %v2884_v27, %s2358_s4 }
 0x36a   :  { %1307 = vrot.lane.b32.xlu1 %v2892_v30, %s2359_s16  ;;  %1305 = vrot.lane.b32.xlu0 %v2886_v28, %s2359_s16 }
 0x36e   :  { %1311 = vrot.lane.b32.xlu1 %v2888_v29, %s2359_s16  ;;  %1309 = vrot.lane.b32.xlu0 %v2884_v27, %s2359_s16 }
 0x372   :  { %1355 = vrot.lane.b32.xlu1 %v2892_v30, %s2360_s17  ;;  %1353 = vrot.lane.b32.xlu0 %v2886_v28, %s2360_s17 }
 0x376   :  { %1359 = vrot.lane.b32.xlu1 %v2888_v29, %s2360_s17  ;;  %1357 = vrot.lane.b32.xlu0 %v2884_v27, %s2360_s17 }
 0x37a   :  { %1399 = vrot.lane.b32.xlu1 %v2892_v30, %s2361_s1  ;;  %1397 = vrot.lane.b32.xlu0 %v2886_v28, %s2361_s1 }
 0x37e   :  { %1403 = vrot.lane.b32.xlu1 %v2888_v29, %s2361_s1  ;;  %1401 = vrot.lane.b32.xlu0 %v2884_v27, %s2361_s1 }
 0x382   :  { %1443 = vrot.lane.b32.xlu1 %v2892_v30, %s2362_s7  ;;  %1441 = vrot.lane.b32.xlu0 %v2886_v28, %s2362_s7 }
 0x386   :  { %1447 = vrot.lane.b32.xlu1 %v2888_v29, %s2362_s7  ;;  %1445 = vrot.lane.b32.xlu0 %v2884_v27, %s2362_s7 }
 0x38a   :  { %1487 = vrot.lane.b32.xlu1 %v2892_v30, %s2365_s18  ;;  %1485 = vrot.lane.b32.xlu0 %v2886_v28, %s2365_s18 }
 0x38e   :  { %1491 = vrot.lane.b32.xlu1 %v2888_v29, %s2365_s18  ;;  %1489 = vrot.lane.b32.xlu0 %v2884_v27, %s2365_s18 }
 0x392   :  { %1569 = vperm.xlu0 %2329, %v1566_v2  }
 0x3c4   :  { %v1177_v38 = vpop.permute.xlu1 %1176  ;;  %v1173_v39 = vpop.permute.xlu0 %1172 }
 0x3c8   :  { %v1179_v45 = vpop.permute.xlu1 %1178  ;;  %v1175_v46 = vpop.permute.xlu0 %1174 }
 0x3c9   :  { %v1183_v48 = vsel %vm1182_vm9, %v1177_v38, %v1179_v45  ;;  %v1186_v49 = vsel %vm1182_vm9, %v1179_v45, %v1173_v39  ;;  %v1184_v50 = vsel %vm1182_vm9, %v1175_v46, %v1177_v38  ;;  %v1185_v51 = vsel %vm1182_vm9, %v1173_v39, %v1175_v46  ;;  %v2053_v46 = vld [vmem:[%s3281_s2 + $0x5] ss:$8 sm:$0xf] }
 0x3ca   :  { %v1209_v52 = vmul.f32 %v1192_v41, %v1186_v49  ;;  %v1212_v53 = vmul.f32 %v1204_v42, %v1183_v48  ;;  %v1210_v54 = vmul.f32 %v1196_v43, %v1185_v51  ;;  %v1211_v55 = vmul.f32 %v1200_v44, %v1184_v50 }
 0x3cb   :  { %v1328_v38 = vrot.slane %v2052_v10, %v2933_v35  ;;  %v1324_v43 = vrot.slane %v2052_v10, %v2929_v33  ;;  %v1332_v44 = vrot.slane %v2052_v10, %v2935_v36  ;;  %v1336_v45 = vrot.slane %v2052_v10, %v2931_v34 }
 0x3cc   :  { %v1220_v56 = vpop.permute.xlu1 %1219  ;;  %v1218_v57 = vpop.permute.xlu0 %1217  ;;  %v1384_v61 = vrot.slane %v2053_v46, %v2931_v34 }
 0x3cd   :  { %v1228_v15 = vsel %vm1225_vm10, %v1218_v57, %v1220_v56 }
 0x3ce   :  { %v1254_v12 = vmul.f32 %v1240_v47, %v1228_v15 }
 0x3d0   :  { %v1224_v62 = vpop.permute.xlu1 %1223  ;;  %v1222_v16 = vpop.permute.xlu0 %1221  ;;  %v2203_v17 = vpack.c.bf16 %v1254_v12, %v1210_v54 }
 0x3d1   :  { %v1229_v63 = vsel %vm1225_vm10, %v1224_v62, %v1218_v57  ;;  %v1226_v5 = vsel %vm1225_vm10, %v1222_v16, %v1224_v62  ;;  %v1227_v6 = vsel %vm1225_vm10, %v1220_v56, %v1222_v16  ;;  %v1372_v56 = vrot.slane %v2053_v46, %v2929_v33 }
 0x3d2   :  { %v1253_v7 = vmul.f32 %v1236_v58, %v1229_v63  ;;  %v1255_v11 = vmul.f32 %v1244_v59, %v1227_v6  ;;  %v1256_v8 = vmul.f32 %v1248_v60, %v1226_v5  ;;  %2204 = vmatprep.subr.bf16.mxu0 %v2203_v17  ;;  %v1376_v16 = vrot.slane %v2053_v46, %v2933_v35  ;;  %v2054_v63 = vld [vmem:[%s3281_s2 + $0x6] ss:$8 sm:$0xf] }
 0x3d3   :  { %v1380_v17 = vrot.slane %v2053_v46, %v2935_v36  ;;  %v2056_v46 = vld [vmem:[%s3281_s2 + $0x20] ss:$8 sm:$0xf] }
 0x3d4   :  { %v1264_v13 = vpop.permute.xlu1 %1263  ;;  %v1262_v9 = vpop.permute.xlu0 %1261  ;;  %v2205_v18 = vpack.c.bf16 %v1253_v7, %v1209_v52  ;;  %v2219_v19 = vpack.c.bf16 %v1256_v8, %v1212_v53  ;;  %v2221_v20 = vpack.c.bf16 %v1255_v11, %v1211_v55 }
 0x3d5   :  { %v1272_v21 = vsel %vm1269_vm11, %v1262_v9, %v1264_v13 }
 0x3d6   :  { %v1298_v23 = vmul.f32 %v1284_v4, %v1272_v21  ;;  %2206 = vmatpush1.bf16.msra.mxu0 %v2205_v18  ;;  %2220 = vmatprep.subr.bf16.mxu1 %v2219_v19  ;;  %v1416_v18 = vrot.slane %v2054_v63, %v2929_v33 }
 0x3d7   :  { %2222 = vmatpush1.bf16.msra.mxu1 %v2221_v20 }
 0x3d8   :  { %v1268_v25 = vpop.permute.xlu1 %1267  ;;  %v1266_v26 = vpop.permute.xlu0 %1265 }
 0x3d9   :  { %v1273_v0 = vsel %vm1269_vm11, %v1268_v25, %v1262_v9  ;;  %v1270_v1 = vsel %vm1269_vm11, %v1266_v26, %v1268_v25  ;;  %v1271_v2 = vsel %vm1269_vm11, %v1264_v13, %v1266_v26  ;;  %v1420_v26 = vrot.slane %v2054_v63, %v2933_v35 }
 0x3da   :  { %v1297_v3 = vmul.f32 %v1280_v22, %v1273_v0  ;;  %v1299_v31 = vmul.f32 %v1288_v24, %v1271_v2  ;;  %v1300_v37 = vmul.f32 %v1292_v14, %v1270_v1  ;;  %v1428_v14 = vrot.slane %v2054_v63, %v2931_v34 }
 0x3db   :  { %v1424_v0 = vrot.slane %v2054_v63, %v2935_v36  ;;  %v1739_v63 = vld [vmem:[%s3282_s3 + $0x88] sm:$0xff] }
 0x3dc   :  { %v1308_v39 = vpop.permute.xlu1 %1307  ;;  %v1306_v40 = vpop.permute.xlu0 %1305 }
 0x3dd   :  { %v1316_v41 = vsel %vm1313_vm12, %v1306_v40, %v1308_v39 }
 0x3de   :  { %v1342_v42 = vmul.f32 %v1328_v38, %v1316_v41 }
 0x3e0   :  { %v1312_v47 = vpop.permute.xlu1 %1311  ;;  %v1310_v48 = vpop.permute.xlu0 %1309  ;;  %v2207_v49 = vpack.c.bf16 %v1342_v42, %v1298_v23 }
 0x3e1   :  { %v1317_v50 = vsel %vm1313_vm12, %v1312_v47, %v1306_v40  ;;  %v1314_v51 = vsel %vm1313_vm12, %v1310_v48, %v1312_v47  ;;  %v1315_v52 = vsel %vm1313_vm12, %v1308_v39, %v1310_v48 }
 0x3e2   :  { %v1341_v53 = vmul.f32 %v1324_v43, %v1317_v50  ;;  %v1343_v54 = vmul.f32 %v1332_v44, %v1315_v52  ;;  %v1344_v55 = vmul.f32 %v1336_v45, %v1314_v51  ;;  %2208 = vmatprep.subr.bf16.mxu0 %v2207_v49 }
 0x3e4   :  { %v1356_v57 = vpop.permute.xlu1 %1355  ;;  %v1354_v15 = vpop.permute.xlu0 %1353  ;;  %v2209_v12 = vpack.c.bf16 %v1341_v53, %v1297_v3  ;;  %v2223_v58 = vpack.c.bf16 %v1344_v55, %v1300_v37  ;;  %v2225_v59 = vpack.c.bf16 %v1343_v54, %v1299_v31  ;;  %v1504_v55 = vrot.slane %v2056_v46, %v2929_v33 }
 0x3e5   :  { %v1364_v60 = vsel %vm1361_vm13, %v1354_v15, %v1356_v57 }
 0x3e6   :  { %v1389_v62 = vmul.f32 %v1372_v56, %v1364_v60  ;;  %2210 = vmatpush1.bf16.msra.mxu0 %v2209_v12  ;;  %2224 = vmatprep.subr.bf16.mxu1 %v2223_v58  ;;  %v1516_v60 = vrot.slane %v2056_v46, %v2931_v34 }
 0x3e7   :  { %2226 = vmatpush1.bf16.msra.mxu1 %v2225_v59 }
 0x3e8   :  { %v1360_v5 = vpop.permute.xlu1 %1359  ;;  %v1358_v6 = vpop.permute.xlu0 %1357  ;;  %v2213_v10 = vpack.c.bf16 %v1389_v62, %v2886_v28 }
 0x3e9   :  { %v1365_v7 = vsel %vm1361_vm13, %v1360_v5, %v1354_v15  ;;  %v1362_v11 = vsel %vm1361_vm13, %v1358_v6, %v1360_v5  ;;  %v1363_v8 = vsel %vm1361_vm13, %v1356_v57, %v1358_v6  ;;  %v1722_v6 = vld [vmem:[%s3282_s3] sm:$0xff] }
 0x3ea   :  { %v1392_v4 = vmul.f32 %v1384_v61, %v1365_v7  ;;  %v1390_v13 = vmul.f32 %v1376_v16, %v1363_v8  ;;  %v1391_v9 = vmul.f32 %v1380_v17, %v1362_v11  ;;  %v1508_v16 = vrot.slane %v2056_v46, %v2933_v35  ;;  %v1723_v7 = vld [vmem:[%s3282_s3 + $0x8] sm:$0xff] }
 0x3eb   :  { %v1512_v17 = vrot.slane %v2056_v46, %v2935_v36  ;;  %v1744_v46 = vld [vmem:[%s3282_s3 + $0xb0] sm:$0xff] }
 0x3ec   :  { %v1400_v19 = vpop.permute.xlu1 %1399  ;;  %v1398_v20 = vpop.permute.xlu0 %1397  ;;  %v2211_v21 = vpack.c.bf16 %v1390_v13, %v2892_v30  ;;  %v2227_v22 = vpack.c.bf16 %v1392_v4, %v2888_v29  ;;  %v2229_v23 = vpack.c.bf16 %v1391_v9, %v2884_v27  ;;  %v2055_v29 = vld [vmem:[%s3281_s2 + $0x7] ss:$8 sm:$0xf] }
 0x3ed   :  { %v1408_v24 = vsel %vm1405_vm14, %v1398_v20, %v1400_v19  ;;  %v1460_v38 = vrot.slane %v2055_v29, %v2929_v33  ;;  %v1472_v43 = vrot.slane %v2055_v29, %v2931_v34  ;;  %v1464_v44 = vrot.slane %v2055_v29, %v2933_v35  ;;  %v1738_v33 = vld [vmem:[%s3282_s3 + $0x80] sm:$0xff]  ;;  %v1755_v9 = vld [vmem:[%s3282_s3 + $0x108] sm:$0xff] }
 0x3ee   :  { %v1433_v25 = vmul.f32 %v1416_v18, %v1408_v24  ;;  %2212 = vmatprep.subr.bf16.mxu0 %v2211_v21  ;;  %2228 = vmatprep.subr.bf16.mxu1 %v2227_v22  ;;  %v1468_v45 = vrot.slane %v2055_v29, %v2935_v36  ;;  %v1770_v34 = vld [vmem:[%s3282_s3 + $0x180] sm:$0xff]  ;;  %v1771_v36 = vld [vmem:[%s3282_s3 + $0x188] sm:$0xff]  ;;  %v1740_v18 = vld [vmem:[%s3282_s3 + $0x90] sm:$0xff] }
 0x3ef   :  { %2214 = vmatpush1.bf16.msra.mxu0 %v2213_v10  ;;  %2230 = vmatpush1.bf16.msra.mxu1 %v2229_v23  ;;  %v1754_v13 = vld [vmem:[%s3282_s3 + $0x100] sm:$0xff]  ;;  %v1772_v22 = vld [vmem:[%s3282_s3 + $0x190] sm:$0xff]  ;;  %v1773_v23 = vld [vmem:[%s3282_s3 + $0x198] sm:$0xff]  ;;  %v2267_v10 = vpack.c.bf16 %v1771_v36, %v1770_v34 }
 0x3f0   :  { %v1404_v27 = vpop.permute.xlu1 %1403  ;;  %v1402_v30 = vpop.permute.xlu0 %1401  ;;  %v1529_v24 = vld [vmem:[%s3287_s8] sm:$0xff]  ;;  %v1725_v29 = vld [vmem:[%s3282_s3 + $0x18] sm:$0xff]  ;;  %v1763_v34 = vld [vmem:[%s3282_s3 + $0x148] sm:$0xff] }
 0x3f1   :  { %v1409_v1 = vsel %vm1405_vm14, %v1404_v27, %v1398_v20  ;;  %v1406_v28 = vsel %vm1405_vm14, %v1402_v30, %v1404_v27  ;;  %v1407_v2 = vsel %vm1405_vm14, %v1400_v19, %v1402_v30  ;;  %v2239_v27 = vpack.c.bf16 %v1741_v32, %v1740_v18  ;;  %v1780_v36 = vld [vmem:[%s3282_s3 + $0x1d0] sm:$0xff]  ;;  %v1782_v32 = vld [vmem:[%s3282_s3 + $0x1e0] sm:$0xff] }
 0x3f2   :  { %v1436_v3 = vmul.f32 %v1428_v14, %v1409_v1  ;;  %v1434_v31 = vmul.f32 %v1420_v26, %v1407_v2  ;;  %v1435_v37 = vmul.f32 %v1424_v0, %v1406_v28  ;;  %v2235_v14 = vpack.c.bf16 %v1739_v63, %v1738_v33  ;;  %v1724_v0 = vld [vmem:[%s3282_s3 + $0x10] sm:$0xff]  ;;  %v1757_v28 = vld [vmem:[%s3282_s3 + $0x118] sm:$0xff]  ;;  %v1742_v2 = vld [vmem:[%s3282_s3 + $0xa0] sm:$0xff] }
 0x3f3   :  { %v2269_v26 = vpack.c.bf16 %v1755_v9, %v1754_v13  ;;  %v2271_v30 = vpack.c.bf16 %v1773_v23, %v1772_v22  ;;  %v1756_v1 = vld [vmem:[%s3282_s3 + $0x110] sm:$0xff]  ;;  %v1762_v63 = vld [vmem:[%s3282_s3 + $0x140] sm:$0xff]  ;;  %v1783_v22 = vld [vmem:[%s3282_s3 + $0x1e8] sm:$0xff] }
 0x3f4   :  { %v1444_v39 = vpop.permute.xlu1 %1443  ;;  %v1442_v40 = vpop.permute.xlu0 %1441  ;;  %v1764_v18 = vld [vmem:[%s3282_s3 + $0x150] sm:$0xff] }
 0x3f5   :  { %v1452_v41 = vsel %vm1449_vm15, %v1442_v40, %v1444_v39 }
 0x3f6   :  { %v1477_v42 = vmul.f32 %v1460_v38, %v1452_v41  ;;  %v2241_v38 = vpack.c.bf16 %v1725_v29, %v1724_v0  ;;  %v1727_v41 = vld [vmem:[%s3282_s3 + $0x28] sm:$0xff]  ;;  %v1734_v0 = vld [vmem:[%s3282_s3 + $0x60] sm:$0xff] }
 0x3f8   :  { %v1448_v47 = vpop.permute.xlu1 %1447  ;;  %v1446_v48 = vpop.permute.xlu0 %1445  ;;  %v2217_v61 = vpack.c.bf16 %v1477_v42, %v1433_v25  ;;  %v2237_v25 = vpack.c.bf16 %v1723_v7, %v1722_v6  ;;  %v1781_v6 = vld [vmem:[%s3282_s3 + $0x1d8] sm:$0xff] }
 0x3f9   :  { %v1453_v49 = vsel %vm1449_vm15, %v1448_v47, %v1442_v40  ;;  %v1450_v50 = vsel %vm1449_vm15, %v1446_v48, %v1448_v47  ;;  %v1451_v51 = vsel %vm1449_vm15, %v1444_v39, %v1446_v48  ;;  %v2273_v39 = vpack.c.bf16 %v1757_v28, %v1756_v1  ;;  %v1726_v40 = vld [vmem:[%s3282_s3 + $0x20] sm:$0xff]  ;;  %v1745_v47 = vld [vmem:[%s3282_s3 + $0xb8] sm:$0xff]  ;;  %v1776_v48 = vld [vmem:[%s3282_s3 + $0x1b0] sm:$0xff] }
 0x3fa   :  { %v1480_v52 = vmul.f32 %v1472_v43, %v1453_v49  ;;  %v1478_v53 = vmul.f32 %v1464_v44, %v1451_v51  ;;  %v1479_v54 = vmul.f32 %v1468_v45, %v1450_v50  ;;  %v1758_v44 = vld [vmem:[%s3282_s3 + $0x120] sm:$0xff]  ;;  %v1759_v45 = vld [vmem:[%s3282_s3 + $0x128] sm:$0xff]  ;;  %v1777_v49 = vld [vmem:[%s3282_s3 + $0x1b8] sm:$0xff]  ;;  %v2245_v50 = vpack.c.bf16 %v1727_v41, %v1726_v40 }
 0x3fb   :  { %v2277_v51 = vpack.c.bf16 %v1759_v45, %v1758_v44  ;;  %v2287_v9 = vpack.c.bf16 %v1781_v6, %v1780_v36  ;;  %v1752_v1 = vld [vmem:[%s3282_s3 + $0xf0] sm:$0xff]  ;;  %v1753_v28 = vld [vmem:[%s3282_s3 + $0xf8] sm:$0xff] }
 0x3fc   :  { %v1488_v56 = vpop.permute.xlu1 %1487  ;;  %v1486_v57 = vpop.permute.xlu0 %1485  ;;  %v2215_v15 = vpack.c.bf16 %v1478_v53, %v1434_v31  ;;  %v2231_v12 = vpack.c.bf16 %v1480_v52, %v1436_v3  ;;  %v2233_v58 = vpack.c.bf16 %v1479_v54, %v1435_v37  ;;  %v1743_v3 = vld [vmem:[%s3282_s3 + $0xa8] sm:$0xff]  ;;  %v1774_v31 = vld [vmem:[%s3282_s3 + $0x1a0] sm:$0xff]  ;;  %v1728_v52 = vld [vmem:[%s3282_s3 + $0x30] sm:$0xff]  ;;  %v2247_v54 = vpack.c.bf16 %v1745_v47, %v1744_v46 }
 0x3fd   :  { %v1496_v59 = vsel %vm1493_vm0, %v1486_v57, %v1488_v56  ;;  %v1775_v37 = vld [vmem:[%s3282_s3 + $0x1a8] sm:$0xff]  ;;  %v2243_v42 = vpack.c.bf16 %v1743_v3, %v1742_v2  ;;  %v1729_v53 = vld [vmem:[%s3282_s3 + $0x38] sm:$0xff]  ;;  %v1784_v2 = vld [vmem:[%s3282_s3 + $0x1f0] sm:$0xff]  ;;  %v2263_v3 = vpack.c.bf16 %v1753_v28, %v1752_v1 }
 0x3fe   :  { %v1521_v62 = vmul.f32 %v1504_v55, %v1496_v59  ;;  %2216 = vmatprep.subr.bf16.mxu0 %v2215_v15  ;;  %2232 = vmatprep.subr.bf16.mxu1 %v2231_v12  ;;  %v2275_v43 = vpack.c.bf16 %v1775_v37, %v1774_v31  ;;  %v2279_v55 = vpack.c.bf16 %v1777_v49, %v1776_v48  ;;  %v1746_v15 = vld [vmem:[%s3282_s3 + $0xc0] sm:$0xff]  ;;  %v1747_v12 = vld [vmem:[%s3282_s3 + $0xc8] sm:$0xff]  ;;  %v1785_v31 = vld [vmem:[%s3282_s3 + $0x1f8] sm:$0xff] }
 0x3ff   :  { %2218 = vmatpush1.bf16.msra.mxu0 %v2217_v61  ;;  %2234 = vmatpush1.bf16.msra.mxu1 %v2233_v58  ;;  %v1778_v58 = vld [vmem:[%s3282_s3 + $0x1c0] sm:$0xff]  ;;  %v1779_v59 = vld [vmem:[%s3282_s3 + $0x1c8] sm:$0xff]  ;;  %v1736_v37 = vld [vmem:[%s3282_s3 + $0x70] sm:$0xff] }
 0x400   :  { %v1492_v5 = vpop.permute.xlu1 %1491  ;;  %v1490_v35 = vpop.permute.xlu0 %1489  ;;  %v2283_v33 = vpack.c.bf16 %v1779_v59, %v1778_v58  ;;  %v1768_v41 = vld [vmem:[%s3282_s3 + $0x170] sm:$0xff] }
 0x401   :  { %v1497_v11 = vsel %vm1493_vm0, %v1492_v5, %v1486_v57  ;;  %v1494_v8 = vsel %vm1493_vm0, %v1490_v35, %v1492_v5  ;;  %v1495_v4 = vsel %vm1493_vm0, %v1488_v56, %v1490_v35  ;;  %v1760_v56 = vld [vmem:[%s3282_s3 + $0x130] sm:$0xff]  ;;  %v1761_v57 = vld [vmem:[%s3282_s3 + $0x138] sm:$0xff] }
 0x402   :  { %v1524_v19 = vmul.f32 %v1516_v60, %v1497_v11  ;;  %v1522_v20 = vmul.f32 %v1508_v16, %v1495_v4  ;;  %v1523_v21 = vmul.f32 %v1512_v17, %v1494_v8  ;;  %v2249_v60 = vpack.c.bf16 %v1729_v53, %v1728_v52  ;;  %v1731_v16 = vld [vmem:[%s3282_s3 + $0x48] sm:$0xff]  ;;  %v1748_v5 = vld [vmem:[%s3282_s3 + $0xd0] sm:$0xff]  ;;  %v1749_v35 = vld [vmem:[%s3282_s3 + $0xd8] sm:$0xff] }
 0x403   :  { %v2281_v61 = vpack.c.bf16 %v1761_v57, %v1760_v56  ;;  %v2251_v17 = vpack.c.bf16 %v1747_v12, %v1746_v15  ;;  %v2285_v11 = vpack.c.bf16 %v1763_v34, %v1762_v63  ;;  %v1732_v8 = vld [vmem:[%s3282_s3 + $0x50] sm:$0xff]  ;;  %v1733_v4 = vld [vmem:[%s3282_s3 + $0x58] sm:$0xff]  ;;  %v2255_v13 = vpack.c.bf16 %v1749_v35, %v1748_v5  ;;  %v1926_v57 = vld [vmem:[%s3289_s10] sm:$0xff] }
 0x404   :  { %1592 = vmatprep.subr.mxu0 %v1522_v20  ;;  %1663 = vmatprep.subr.mxu1 %v1524_v19  ;;  %v1765_v19 = vld [vmem:[%s3282_s3 + $0x158] sm:$0xff]  ;;  %v1750_v20 = vld [vmem:[%s3282_s3 + $0xe0] sm:$0xff]  ;;  %v2257_v23 = vpack.c.bf16 %v1733_v4, %v1732_v8  ;;  %v1929_v12 = vld [vmem:[%s3290_s11 + $0x8] sm:$0x3] }
 0x405   :  { %1593 = vmatpush1.msra.mxu0 %v1521_v62  ;;  %1664 = vmatpush1.msra.mxu1 %v1523_v21  ;;  %v1730_v62 = vld [vmem:[%s3282_s3 + $0x40] sm:$0xff]  ;;  %v1751_v21 = vld [vmem:[%s3282_s3 + $0xe8] sm:$0xff] }
 0x406   :  { %2057 = vmatmul.mubr.msk.f32.vlgmr.msra.gmra.mrb[0].mxu0 %vm1572_vm1, %v1529_v24  ;;  %2058 = vmatmul.mubr.msk.f32.vlgmr.msra.gmra.mrb[0].mxu1 %vm1572_vm1, %v1529_v24  ;;  %v2253_v7 = vpack.c.bf16 %v1731_v16, %v1730_v62  ;;  %v2289_v24 = vpack.c.bf16 %v1765_v19, %v1764_v18  ;;  %v1928_v15 = vld [vmem:[%s3290_s11] sm:$0xff] }
 0x407   :  { %2236 = vmatprep.subr.bf16.mxu0 %v2235_v14  ;;  %2268 = vmatprep.subr.bf16.mxu1 %v2267_v10  ;;  %v2259_v14 = vpack.c.bf16 %v1751_v21, %v1750_v20  ;;  %v2291_v10 = vpack.c.bf16 %v1783_v22, %v1782_v32 }
 0x408   :  { %2238 = vmatpush3.bf16.msra.mxu0 %v2237_v25  ;;  %2270 = vmatpush3.bf16.msra.mxu1 %v2269_v26  ;;  %v1766_v25 = vld [vmem:[%s3282_s3 + $0x160] sm:$0xff]  ;;  %v1767_v26 = vld [vmem:[%s3282_s3 + $0x168] sm:$0xff] }
 0x409   :  { %2240 = vmatprep.subr.bf16.mxu0 %v2239_v27  ;;  %2272 = vmatprep.subr.bf16.mxu1 %v2271_v30  ;;  %v2293_v29 = vpack.c.bf16 %v1767_v26, %v1766_v25  ;;  %v1735_v27 = vld [vmem:[%s3282_s3 + $0x68] sm:$0xff] }
 0x40a   :  { %v2261_v30 = vpack.c.bf16 %v1735_v27, %v1734_v0  ;;  %1932 = vperm.xlu1 %2330, %v1928_v15  }
 0x40c   :  { %2242 = vmatpush3.bf16.msra.mxu0 %v2241_v38  ;;  %2274 = vmatpush3.bf16.msra.mxu1 %v2273_v39  ;;  %v1737_v38 = vld [vmem:[%s3282_s3 + $0x78] sm:$0xff]  ;;  %v2295_v39 = vpack.c.bf16 %v1785_v31, %v1784_v2 }
 0x40d   :  { %2244 = vmatprep.subr.bf16.mxu0 %v2243_v42  ;;  %2276 = vmatprep.subr.bf16.mxu1 %v2275_v43  ;;  %v2265_v40 = vpack.c.bf16 %v1737_v38, %v1736_v37  ;;  %v1769_v42 = vld [vmem:[%s3282_s3 + $0x178] sm:$0xff] }
 0x40e   :  { %v2297_v43 = vpack.c.bf16 %v1769_v42, %v1768_v41  ;;  %1937 = vperm.xlu1 %2330, %v1929_v12  }
 0x410   :  { %2246 = vmatpush3.bf16.msra.mxu0 %v2245_v50  ;;  %2278 = vmatpush3.bf16.msra.mxu1 %v2277_v51 }
 0x411   :  { %2248 = vmatprep.subr.bf16.mxu0 %v2247_v54  ;;  %2280 = vmatprep.subr.bf16.mxu1 %v2279_v55  ;;  %v1570_v44 = vpop.permute.xlu0 %1569 }
 0x414   :  { %2250 = vmatpush3.bf16.msra.mxu0 %v2249_v60  ;;  %2282 = vmatpush3.bf16.msra.mxu1 %v2281_v61 }
 0x415   :  { %2252 = vmatprep.subr.bf16.mxu0 %v2251_v17  ;;  %2284 = vmatprep.subr.bf16.mxu1 %v2283_v33  ;;  %v1927_v33 = vld [vmem:[%s3289_s10 + $0x8] sm:$0x3] }
 0x418   :  { %2254 = vmatpush3.bf16.msra.mxu0 %v2253_v7  ;;  %2286 = vmatpush3.bf16.msra.mxu1 %v2285_v11 }
 0x419   :  { %2256 = vmatprep.subr.bf16.mxu0 %v2255_v13  ;;  %2288 = vmatprep.subr.bf16.mxu1 %v2287_v9 }
 0x41c   :  { %2258 = vmatpush3.bf16.msra.mxu0 %v2257_v23  ;;  %2290 = vmatpush3.bf16.msra.mxu1 %v2289_v24 }
 0x41d   :  { %2260 = vmatprep.subr.bf16.mxu0 %v2259_v14  ;;  %2292 = vmatprep.subr.bf16.mxu1 %v2291_v10 }
 0x420   :  { %2294 = vmatpush3.bf16.msra.mxu1 %v2293_v29  ;;  %2262 = vmatpush3.bf16.msra.mxu0 %v2261_v30 }
 0x421   :  { %2264 = vmatprep.subr.bf16.mxu0 %v2263_v3  ;;  %2296 = vmatprep.subr.bf16.mxu1 %v2295_v39 }
 0x424   :  { %2266 = vmatpush3.bf16.msra.mxu0 %v2265_v40  ;;  %2298 = vmatpush3.bf16.msra.mxu1 %v2297_v43 }
 0x489   :  { %v1933_v63 = vpop.permute.xlu1 %1932 }
 0x48d   :  { %v1938_v34 = vpop.permute.xlu1 %1937 }
 0x4d9   :  { %v1713_v45 = vpop.f32.mrb[0].mxu1  ;;  %v1642_v46 = vpop.f32.mrb[0].mxu0 }
 0x4da   :  { %v1714_v47 = vadd.f32 %v1713_v45, %v1570_v44  ;;  %v1643_v48 = vadd.f32 %v1642_v46, %v1570_v44  ;;  %v1644_v49 = vpop.f32.mrb[1].mxu0  ;;  %v1715_v50 = vpop.f32.mrb[1].mxu1 }
 0x4db   :  { %v1645_v51 = vadd.f32 %v1644_v49, %v1570_v44  ;;  %v1716_v52 = vadd.f32 %v1715_v50, %v1570_v44 }
 0x4dc   :  { %v1720_v55 = vmax.f32 %v1714_v47, 0.0  ;;  %v1718_v56 = vmax.f32 %v1643_v48, 0.0 }
 0x4dd   :  { %v1719_v53 = vmax.f32 %v1645_v51, 0.0  ;;  %v1721_v54 = vmax.f32 %v1716_v52, 0.0 }
 0x4df   :  { %1850 = vmatprep.mubr.f32.mxu0 %v1719_v53  ;;  %1920 = vmatprep.mubr.f32.mxu1 %v1721_v54 }
 0x4e0   :  { %1851 = vmatmul.mubr.f32.vlgmr.msra.gmra.mrb[2].mxu0 %v1718_v56  ;;  %1921 = vmatmul.mubr.f32.vlgmr.msra.gmra.mrb[2].mxu1 %v1720_v55 }
 0x4e1   :  { %2136 = vmatprep.mubr.msk.f32.mxu0 %vm1940_vm2, %v1926_v57 }
 0x5b3   :  { %v2093_v58 = vpop.f32.mrb[2].mxu0  ;;  %v2128_v59 = vpop.f32.mrb[2].mxu1 }
 0x5b4   :  { %v2094_v60 = vpop.f32.mrb[3].mxu0  ;;  %v2129_v61 = vpop.f32.mrb[3].mxu1 }
 0x5b5   :  { %v2095_v62 = vadd.f32 %v2094_v60, %v2093_v58  ;;  %v2130_v16 = vadd.f32 %v2129_v61, %v2128_v59 }
 0x5b7   :  { %v1923_v17 = vadd.f32 %v2130_v16, %v2095_v62 }
 0x5b9   :  { %2134 = vmatprep.subr.mxu0 %v1923_v17 }
 0x5ba   :  { %2135 = vmatpush3.msra.mxu0 %v1923_v17 }
 0x5bb   :  { %2137 = vmatmul.mubr.msk.f32.vlgmr.msra.gmra.mrb[4].mxu0 %vm1940_vm2, %v1927_v33 }
 0x68e   :  { %v2138_v5 = vpop.f32.mrb[4].mxu0 }
 0x68f   :  { %v2019_v35 = vadd.f32 %v2138_v5, %v1938_v34  ;;  %v2013_v36 = vpop.f32.mrb[5].mxu0 }
 0x690   :  { %v2014_v6 = vadd.f32 %v2013_v36, %v1933_v63 }
 0x691   :  { %2024 = vst.msk [vmem:[%s3291_s12 + $0x8] sm:$0x3] %vm2023_vm3, %v2019_v35 }
 0x692   :  { %2022 = vst.msk [vmem:[%s3291_s12] sm:$0xff] %vm1940_vm2, %v2014_v6 }
 0x693   :  { %2029 = vsyncpa [#allocation5], 1 }

</bundles_post_ra>
